<compile_context>
chip_gen: v7x
topology: tpu7x:2x2x1
jax: 0.10.0
libtpu: 0.0.40
codegen_flags: <defaults>
</compile_context>

<pallas_src>
import functools
import math

import jax
import jax.numpy as jnp
from jax.experimental import pallas as pl
from jax.experimental.pallas import tpu as pltpu


# --------------------------------------------------------------------------
# Model dimensions (synthetic, reduced finbert-tone)
# --------------------------------------------------------------------------
VOCAB = 64
HIDDEN = 32
NUM_HEADS = 4
NUM_LAYERS = 2
INTERMEDIATE = 64
MAX_POS = 16
TYPE_VOCAB = 2
LN_EPS = 1e-12


def _layernorm(x, g, b, eps):
    mean = jnp.mean(x, axis=-1, keepdims=True)
    var = jnp.mean(jnp.square(x - mean), axis=-1, keepdims=True)
    return (x - mean) * jax.lax.rsqrt(var + eps) * g + b


# --------------------------------------------------------------------------
# Single fused kernel: embeddings -> N transformer layers -> pooler
# --------------------------------------------------------------------------
def _finbert_kernel(ids_ref, mask_ref,
                    wemb_ref, pemb_ref, temb_ref, eg_ref, eb_ref,
                    wqkv_ref, bqkv_ref, wo_ref, bo_ref, g1_ref, b1_ref,
                    wi_ref, bi_ref, wf_ref, bf_ref, g2_ref, b2_ref,
                    wp_ref, bp_ref,
                    pooled_ref,
                    *, batch, seq, num_heads, num_layers, scale, eps):
    bs = batch * seq
    vocab, hidden = wemb_ref.shape
    d = hidden // num_heads

    # ---- Embeddings: in-kernel gather via one-hot matmul + LayerNorm ------
    ids = ids_ref[...]                                            # [BS, 1] i32
    onehot = (jax.lax.broadcasted_iota(jnp.int32, (bs, vocab), 1)
              == ids).astype(jnp.float32)                         # [BS, VOCAB]
    x = jnp.dot(onehot, wemb_ref[...], preferred_element_type=jnp.float32)

    pos = pemb_ref[0:seq, :]                                      # [S, H]
    x = x + jnp.concatenate([pos] * batch, axis=0)                # [BS, H]
    # TODO(synk): token_type_ids are implicitly all-zero (HF default for this
    # module); nonzero segment ids are not supported here.
    x = x + temb_ref[0:1, :]
    x = _layernorm(x, eg_ref[...], eb_ref[...], eps)

    # ---- Attention bias (block-diagonal per-sequence + key padding), ------
    # ---- built ONCE and hoisted out of the layer / head loops.       ------
    row = jax.lax.broadcasted_iota(jnp.int32, (bs, bs), 0)
    col = jax.lax.broadcasted_iota(jnp.int32, (bs, bs), 1)

    def _in_block(v, b):
        lo = b * seq
        return (v >= lo) & (v < lo + seq)

    same_seq = _in_block(row, 0) & _in_block(col, 0)
    for b in range(1, batch):
        same_seq = same_seq | (_in_block(row, b) & _in_block(col, b))
    keep = same_seq & (mask_ref[...] > 0)                         # [BS, BS]
    bias = jnp.where(keep, 0.0, -1e9).astype(jnp.float32)

    # ---- Transformer layers (statically unrolled) --------------------------
    for l in range(num_layers):
        wqkv = wqkv_ref[l]
        bqkv = bqkv_ref[l]
        wo = wo_ref[l]
        bo = bo_ref[l]
        g1 = g1_ref[l]
        b1 = b1_ref[l]
        wi = wi_ref[l]
        bi = bi_ref[l]
        wf = wf_ref[l]
        bf = bf_ref[l]
        g2 = g2_ref[l]
        b2 = b2_ref[l]

        # Fused Q/K/V projection: one [BS,H] x [H,3H] MXU pass.
        qkv = jnp.dot(x, wqkv, preferred_element_type=jnp.float32) + bqkv

        ctx_heads = []
        for h in range(num_heads):
            qh = qkv[:, h * d:(h + 1) * d]
            kh = qkv[:, hidden + h * d:hidden + (h + 1) * d]
            vh = qkv[:, 2 * hidden + h * d:2 * hidden + (h + 1) * d]
            s = jax.lax.dot_general(
                qh, kh, (((1,), (1,)), ((), ())),
                preferred_element_type=jnp.float32) * scale + bias
            s = s - jnp.max(s, axis=-1, keepdims=True)
            p = jnp.exp(s)
            p = p / jnp.sum(p, axis=-1, keepdims=True)
            ctx_heads.append(
                jnp.dot(p, vh, preferred_element_type=jnp.float32))   # [BS, d]

        # Single output projection over the concatenated context slab.
        ctx = jnp.concatenate(ctx_heads, axis=-1)                     # [BS, H]
        attn = jnp.dot(ctx, wo, preferred_element_type=jnp.float32) + bo
        x = _layernorm(x + attn, g1, b1, eps)

        # TODO(synk): HF BERT uses exact (erf) GELU; tanh approximation here.
        ff = jax.nn.gelu(
            jnp.dot(x, wi, preferred_element_type=jnp.float32) + bi,
            approximate=True)
        ff = jnp.dot(ff, wf, preferred_element_type=jnp.float32) + bf
        x = _layernorm(x + ff, g2, b2, eps)

    # ---- Pooler: tanh(W * hidden[:, 0] + b) --------------------------------
    cls = jnp.concatenate([x[b * seq:b * seq + 1, :] for b in range(batch)],
                          axis=0)                                     # [B, H]
    pooled = jnp.tanh(
        jnp.dot(cls, wp_ref[...], preferred_element_type=jnp.float32)
        + bp_ref[...])
    pooled_ref[...] = pooled.astype(pooled_ref.dtype)


# --------------------------------------------------------------------------
# Parameter init (synthetic, deterministic).  Per-layer weights are stacked
# along a leading layer axis so the whole model is a flat set of arrays that
# feed one pallas_call.  Biases / LN params kept 2-D per layer -> no reshape
# glue in the kernel.
# --------------------------------------------------------------------------
def init_params(key):
    keys = iter(jax.random.split(key, 8 + NUM_LAYERS * 8))

    def nrm(shape):
        return jax.random.normal(next(keys), shape, jnp.float32) * 0.02

    def stack(shape):
        return jnp.stack([nrm(shape) for _ in range(NUM_LAYERS)], axis=0)

    return {
        "word_emb": nrm((VOCAB, HIDDEN)),
        "pos_emb": nrm((MAX_POS, HIDDEN)),
        "type_emb": nrm((TYPE_VOCAB, HIDDEN)),
        "emb_ln_g": jnp.ones((1, HIDDEN), jnp.float32),
        "emb_ln_b": jnp.zeros((1, HIDDEN), jnp.float32),
        # stacked per-layer weights [L, ...]
        "wqkv": stack((HIDDEN, 3 * HIDDEN)),                 # fused Q|K|V
        "bqkv": jnp.zeros((NUM_LAYERS, 1, 3 * HIDDEN), jnp.float32),
        "wo": stack((HIDDEN, HIDDEN)),
        "bo": jnp.zeros((NUM_LAYERS, 1, HIDDEN), jnp.float32),
        "ln1_g": jnp.ones((NUM_LAYERS, 1, HIDDEN), jnp.float32),
        "ln1_b": jnp.zeros((NUM_LAYERS, 1, HIDDEN), jnp.float32),
        "wi": stack((HIDDEN, INTERMEDIATE)),
        "bi": jnp.zeros((NUM_LAYERS, 1, INTERMEDIATE), jnp.float32),
        "wf": stack((INTERMEDIATE, HIDDEN)),
        "bf": jnp.zeros((NUM_LAYERS, 1, HIDDEN), jnp.float32),
        "ln2_g": jnp.ones((NUM_LAYERS, 1, HIDDEN), jnp.float32),
        "ln2_b": jnp.zeros((NUM_LAYERS, 1, HIDDEN), jnp.float32),
        # pooler
        "wp": nrm((HIDDEN, HIDDEN)),
        "bp": jnp.zeros((1, HIDDEN), jnp.float32),
    }


# --------------------------------------------------------------------------
# FinBert forward (returns pooled_output, as the PyTorch module does)
# --------------------------------------------------------------------------
def finbert_forward(params, input_ids, mask):
    B, S = input_ids.shape
    d = HIDDEN // NUM_HEADS
    scale = 1.0 / math.sqrt(d)

    ids2d = input_ids.astype(jnp.int32).reshape(B * S, 1)     # [BS, 1]
    mask2d = mask.astype(jnp.int32).reshape(1, B * S)         # [1, BS] (keys)

    args = [
        ids2d, mask2d,
        params["word_emb"], params["pos_emb"], params["type_emb"],
        params["emb_ln_g"], params["emb_ln_b"],
        params["wqkv"], params["bqkv"], params["wo"], params["bo"],
        params["ln1_g"], params["ln1_b"],
        params["wi"], params["bi"], params["wf"], params["bf"],
        params["ln2_g"], params["ln2_b"],
        params["wp"], params["bp"],
    ]

    kern = functools.partial(
        _finbert_kernel,
        batch=B, seq=S, num_heads=NUM_HEADS, num_layers=NUM_LAYERS,
        scale=scale, eps=LN_EPS)

    vmem = pl.BlockSpec(memory_space=pltpu.MemorySpace.VMEM)
    # Single launch, no grid: the whole model (weights + [BS,H] activations)
    # is VMEM-resident; everything happens in one invocation.
    pooled = pl.pallas_call(
        kern,
        out_shape=jax.ShapeDtypeStruct((B, HIDDEN), jnp.float32),
        in_specs=[vmem] * len(args),
        out_specs=vmem,
    )(*args)
    return pooled                                             # [B, H]


# --------------------------------------------------------------------------

if __name__ == "__main__":
    key = jax.random.PRNGKey(0)
    pkey, ikey = jax.random.split(key)

    B, S = 2, 8
    params = init_params(pkey)
    input_ids = jax.random.randint(ikey, (B, S), 0, VOCAB, dtype=jnp.int32)
    mask = jnp.ones((B, S), dtype=jnp.int32)
    mask = mask.at[1, 6:].set(0)   # pad out the tail of the second sequence

    fwd = jax.jit(finbert_forward)
    pooled = fwd(params, input_ids, mask)
    jax.block_until_ready(pooled)

    # The PyTorch module returns pooled_output.tolist()
    _ = pooled.tolist()
    assert pooled.shape == (B, HIDDEN)
    print("KERNEL_OK")
</pallas_src>

<mosaic_0001>
module attributes {stable_mosaic.version = 11 : i64} {
  func.func @_finbert_kernel(%arg0: memref<16x1xi32, #tpu.memory_space<vmem>>, %arg1: memref<1x16xi32, #tpu.memory_space<vmem>>, %arg2: memref<64x32xf32, #tpu.memory_space<vmem>>, %arg3: memref<16x32xf32, #tpu.memory_space<vmem>>, %arg4: memref<2x32xf32, #tpu.memory_space<vmem>>, %arg5: memref<1x32xf32, #tpu.memory_space<vmem>>, %arg6: memref<1x32xf32, #tpu.memory_space<vmem>>, %arg7: memref<2x32x96xf32, #tpu.memory_space<vmem>>, %arg8: memref<2x1x96xf32, #tpu.memory_space<vmem>>, %arg9: memref<2x32x32xf32, #tpu.memory_space<vmem>>, %arg10: memref<2x1x32xf32, #tpu.memory_space<vmem>>, %arg11: memref<2x1x32xf32, #tpu.memory_space<vmem>>, %arg12: memref<2x1x32xf32, #tpu.memory_space<vmem>>, %arg13: memref<2x32x64xf32, #tpu.memory_space<vmem>>, %arg14: memref<2x1x64xf32, #tpu.memory_space<vmem>>, %arg15: memref<2x64x32xf32, #tpu.memory_space<vmem>>, %arg16: memref<2x1x32xf32, #tpu.memory_space<vmem>>, %arg17: memref<2x1x32xf32, #tpu.memory_space<vmem>>, %arg18: memref<2x1x32xf32, #tpu.memory_space<vmem>>, %arg19: memref<32x32xf32, #tpu.memory_space<vmem>>, %arg20: memref<1x32xf32, #tpu.memory_space<vmem>>, %arg21: memref<2x32xf32, #tpu.memory_space<vmem>>) attributes {dimension_semantics = [], scalar_prefetch = 0 : i64, scratch_operands = 0 : i64, tpu.core_type = #tpu.core_type<tc>} {
    %c0 = arith.constant 0 : index
    %c0_0 = arith.constant 0 : index
    %0 = vector.load %arg0[%c0, %c0_0] : memref<16x1xi32, #tpu.memory_space<vmem>>, vector<16x1xi32>
    %1 = tpu.iota {dimensions = array<i32: 1>} : vector<16x64xi32>
    %2 = vector.broadcast %0 : vector<16x1xi32> to vector<16x64xi32>
    %3 = arith.cmpi eq, %1, %2 : vector<16x64xi32>
    %4 = arith.extui %3 : vector<16x64xi1> to vector<16x64xi32>
    %5 = arith.sitofp %4 : vector<16x64xi32> to vector<16x64xf32>
    %c0_1 = arith.constant 0 : index
    %c0_2 = arith.constant 0 : index
    %6 = vector.load %arg2[%c0_1, %c0_2] : memref<64x32xf32, #tpu.memory_space<vmem>>, vector<64x32xf32>
    %cst = arith.constant dense<0.000000e+00> : vector<16x32xf32>
    %7 = tpu.matmul %5, %6, %cst {dimension_numbers = #tpu.dot_dimension_numbers<[1], [0], [0], [1], [0, 0, 1, 1], [], []>} : vector<16x64xf32>, vector<64x32xf32>, vector<16x32xf32> -> vector<16x32xf32>
    %c0_3 = arith.constant 0 : index
    %c0_4 = arith.constant 0 : index
    %8 = vector.load %arg3[%c0_3, %c0_4] : memref<16x32xf32, #tpu.memory_space<vmem>>, vector<8x32xf32>
    %9 = tpu.concatenate %8, %8 in 0 : vector<8x32xf32>, vector<8x32xf32> -> vector<16x32xf32>
    %10 = arith.addf %7, %9 : vector<16x32xf32>
    %c0_5 = arith.constant 0 : index
    %c0_6 = arith.constant 0 : index
    %11 = vector.load %arg4[%c0_5, %c0_6] : memref<2x32xf32, #tpu.memory_space<vmem>>, vector<1x32xf32>
    %12 = vector.broadcast %11 : vector<1x32xf32> to vector<16x32xf32>
    %13 = arith.addf %10, %12 : vector<16x32xf32>
    %c0_7 = arith.constant 0 : index
    %c0_8 = arith.constant 0 : index
    %14 = vector.load %arg5[%c0_7, %c0_8] : memref<1x32xf32, #tpu.memory_space<vmem>>, vector<1x32xf32>
    %c0_9 = arith.constant 0 : index
    %c0_10 = arith.constant 0 : index
    %15 = vector.load %arg6[%c0_9, %c0_10] : memref<1x32xf32, #tpu.memory_space<vmem>>, vector<1x32xf32>
    %cst_11 = arith.constant dense<0.000000e+00> : vector<16xf32>
    %16 = vector.multi_reduction <add>, %13, %cst_11 [1] : vector<16x32xf32> to vector<16xf32>
    %17 = vector.shape_cast %16 : vector<16xf32> to vector<16x1xf32>
    %cst_12 = arith.constant 3.200000e+01 : f32
    %18 = vector.broadcast %cst_12 : f32 to vector<16x1xf32>
    %19 = arith.divf %17, %18 : vector<16x1xf32>
    %20 = vector.broadcast %19 : vector<16x1xf32> to vector<16x32xf32>
    %21 = arith.subf %13, %20 : vector<16x32xf32>
    %22 = arith.mulf %21, %21 : vector<16x32xf32>
    %cst_13 = arith.constant dense<0.000000e+00> : vector<16xf32>
    %23 = vector.multi_reduction <add>, %22, %cst_13 [1] : vector<16x32xf32> to vector<16xf32>
    %24 = vector.shape_cast %23 : vector<16xf32> to vector<16x1xf32>
    %cst_14 = arith.constant 3.200000e+01 : f32
    %25 = vector.broadcast %cst_14 : f32 to vector<16x1xf32>
    %26 = arith.divf %24, %25 : vector<16x1xf32>
    %27 = vector.broadcast %19 : vector<16x1xf32> to vector<16x32xf32>
    %28 = arith.subf %13, %27 : vector<16x32xf32>
    %cst_15 = arith.constant 9.99999996E-13 : f32
    %29 = vector.broadcast %cst_15 : f32 to vector<16x1xf32>
    %30 = arith.addf %26, %29 : vector<16x1xf32>
    %31 = math.rsqrt %30 : vector<16x1xf32>
    %32 = vector.broadcast %31 : vector<16x1xf32> to vector<16x32xf32>
    %33 = arith.mulf %28, %32 : vector<16x32xf32>
    %34 = vector.broadcast %14 : vector<1x32xf32> to vector<16x32xf32>
    %35 = arith.mulf %33, %34 : vector<16x32xf32>
    %36 = vector.broadcast %15 : vector<1x32xf32> to vector<16x32xf32>
    %37 = arith.addf %35, %36 : vector<16x32xf32>
    %38 = tpu.iota {dimensions = array<i32: 0>} : vector<16x16xi32>
    %39 = tpu.iota {dimensions = array<i32: 1>} : vector<16x16xi32>
    %c0_i32 = arith.constant 0 : i32
    %40 = vector.broadcast %c0_i32 : i32 to vector<16x16xi32>
    %41 = arith.cmpi sge, %38, %40 : vector<16x16xi32>
    %c8_i32 = arith.constant 8 : i32
    %42 = vector.broadcast %c8_i32 : i32 to vector<16x16xi32>
    %43 = arith.cmpi slt, %38, %42 : vector<16x16xi32>
    %44 = arith.andi %41, %43 : vector<16x16xi1>
    %c0_i32_16 = arith.constant 0 : i32
    %45 = vector.broadcast %c0_i32_16 : i32 to vector<16x16xi32>
    %46 = arith.cmpi sge, %39, %45 : vector<16x16xi32>
    %c8_i32_17 = arith.constant 8 : i32
    %47 = vector.broadcast %c8_i32_17 : i32 to vector<16x16xi32>
    %48 = arith.cmpi slt, %39, %47 : vector<16x16xi32>
    %49 = arith.andi %46, %48 : vector<16x16xi1>
    %50 = arith.andi %44, %49 : vector<16x16xi1>
    %c8_i32_18 = arith.constant 8 : i32
    %51 = vector.broadcast %c8_i32_18 : i32 to vector<16x16xi32>
    %52 = arith.cmpi sge, %38, %51 : vector<16x16xi32>
    %c16_i32 = arith.constant 16 : i32
    %53 = vector.broadcast %c16_i32 : i32 to vector<16x16xi32>
    %54 = arith.cmpi slt, %38, %53 : vector<16x16xi32>
    %55 = arith.andi %52, %54 : vector<16x16xi1>
    %c8_i32_19 = arith.constant 8 : i32
    %56 = vector.broadcast %c8_i32_19 : i32 to vector<16x16xi32>
    %57 = arith.cmpi sge, %39, %56 : vector<16x16xi32>
    %c16_i32_20 = arith.constant 16 : i32
    %58 = vector.broadcast %c16_i32_20 : i32 to vector<16x16xi32>
    %59 = arith.cmpi slt, %39, %58 : vector<16x16xi32>
    %60 = arith.andi %57, %59 : vector<16x16xi1>
    %61 = arith.andi %55, %60 : vector<16x16xi1>
    %62 = arith.ori %50, %61 : vector<16x16xi1>
    %c0_21 = arith.constant 0 : index
    %c0_22 = arith.constant 0 : index
    %63 = vector.load %arg1[%c0_21, %c0_22] : memref<1x16xi32, #tpu.memory_space<vmem>>, vector<1x16xi32>
    %c0_i32_23 = arith.constant 0 : i32
    %64 = vector.broadcast %c0_i32_23 : i32 to vector<1x16xi32>
    %65 = arith.cmpi sgt, %63, %64 : vector<1x16xi32>
    %66 = vector.broadcast %65 : vector<1x16xi1> to vector<16x16xi1>
    %67 = arith.andi %62, %66 : vector<16x16xi1>
    %cst_24 = arith.constant 0.000000e+00 : f32
    %cst_25 = arith.constant -1.000000e+09 : f32
    %68 = vector.broadcast %cst_24 : f32 to vector<16x16xf32>
    %69 = vector.broadcast %cst_25 : f32 to vector<16x16xf32>
    %70 = arith.select %67, %68, %69 : vector<16x16xi1>, vector<16x16xf32>
    %c0_26 = arith.constant 0 : index
    %c0_27 = arith.constant 0 : index
    %c0_28 = arith.constant 0 : index
    %71 = vector.load %arg7[%c0_26, %c0_27, %c0_28] : memref<2x32x96xf32, #tpu.memory_space<vmem>>, vector<1x32x96xf32>
    %72 = vector.shape_cast %71 : vector<1x32x96xf32> to vector<32x96xf32>
    %c0_29 = arith.constant 0 : index
    %c0_30 = arith.constant 0 : index
    %c0_31 = arith.constant 0 : index
    %73 = vector.load %arg8[%c0_29, %c0_30, %c0_31] : memref<2x1x96xf32, #tpu.memory_space<vmem>>, vector<1x1x96xf32>
    %74 = vector.shape_cast %73 : vector<1x1x96xf32> to vector<1x96xf32>
    %c0_32 = arith.constant 0 : index
    %c0_33 = arith.constant 0 : index
    %c0_34 = arith.constant 0 : index
    %75 = vector.load %arg9[%c0_32, %c0_33, %c0_34] : memref<2x32x32xf32, #tpu.memory_space<vmem>>, vector<1x32x32xf32>
    %76 = vector.shape_cast %75 : vector<1x32x32xf32> to vector<32x32xf32>
    %c0_35 = arith.constant 0 : index
    %c0_36 = arith.constant 0 : index
    %c0_37 = arith.constant 0 : index
    %77 = vector.load %arg10[%c0_35, %c0_36, %c0_37] : memref<2x1x32xf32, #tpu.memory_space<vmem>>, vector<1x1x32xf32>
    %78 = vector.shape_cast %77 : vector<1x1x32xf32> to vector<1x32xf32>
    %c0_38 = arith.constant 0 : index
    %c0_39 = arith.constant 0 : index
    %c0_40 = arith.constant 0 : index
    %79 = vector.load %arg11[%c0_38, %c0_39, %c0_40] : memref<2x1x32xf32, #tpu.memory_space<vmem>>, vector<1x1x32xf32>
    %80 = vector.shape_cast %79 : vector<1x1x32xf32> to vector<1x32xf32>
    %c0_41 = arith.constant 0 : index
    %c0_42 = arith.constant 0 : index
    %c0_43 = arith.constant 0 : index
    %81 = vector.load %arg12[%c0_41, %c0_42, %c0_43] : memref<2x1x32xf32, #tpu.memory_space<vmem>>, vector<1x1x32xf32>
    %82 = vector.shape_cast %81 : vector<1x1x32xf32> to vector<1x32xf32>
    %c0_44 = arith.constant 0 : index
    %c0_45 = arith.constant 0 : index
    %c0_46 = arith.constant 0 : index
    %83 = vector.load %arg13[%c0_44, %c0_45, %c0_46] : memref<2x32x64xf32, #tpu.memory_space<vmem>>, vector<1x32x64xf32>
    %84 = vector.shape_cast %83 : vector<1x32x64xf32> to vector<32x64xf32>
    %c0_47 = arith.constant 0 : index
    %c0_48 = arith.constant 0 : index
    %c0_49 = arith.constant 0 : index
    %85 = vector.load %arg14[%c0_47, %c0_48, %c0_49] : memref<2x1x64xf32, #tpu.memory_space<vmem>>, vector<1x1x64xf32>
    %86 = vector.shape_cast %85 : vector<1x1x64xf32> to vector<1x64xf32>
    %c0_50 = arith.constant 0 : index
    %c0_51 = arith.constant 0 : index
    %c0_52 = arith.constant 0 : index
    %87 = vector.load %arg15[%c0_50, %c0_51, %c0_52] : memref<2x64x32xf32, #tpu.memory_space<vmem>>, vector<1x64x32xf32>
    %88 = vector.shape_cast %87 : vector<1x64x32xf32> to vector<64x32xf32>
    %c0_53 = arith.constant 0 : index
    %c0_54 = arith.constant 0 : index
    %c0_55 = arith.constant 0 : index
    %89 = vector.load %arg16[%c0_53, %c0_54, %c0_55] : memref<2x1x32xf32, #tpu.memory_space<vmem>>, vector<1x1x32xf32>
    %90 = vector.shape_cast %89 : vector<1x1x32xf32> to vector<1x32xf32>
    %c0_56 = arith.constant 0 : index
    %c0_57 = arith.constant 0 : index
    %c0_58 = arith.constant 0 : index
    %91 = vector.load %arg17[%c0_56, %c0_57, %c0_58] : memref<2x1x32xf32, #tpu.memory_space<vmem>>, vector<1x1x32xf32>
    %92 = vector.shape_cast %91 : vector<1x1x32xf32> to vector<1x32xf32>
    %c0_59 = arith.constant 0 : index
    %c0_60 = arith.constant 0 : index
    %c0_61 = arith.constant 0 : index
    %93 = vector.load %arg18[%c0_59, %c0_60, %c0_61] : memref<2x1x32xf32, #tpu.memory_space<vmem>>, vector<1x1x32xf32>
    %94 = vector.shape_cast %93 : vector<1x1x32xf32> to vector<1x32xf32>
    %cst_62 = arith.constant dense<0.000000e+00> : vector<16x96xf32>
    %95 = tpu.matmul %37, %72, %cst_62 {dimension_numbers = #tpu.dot_dimension_numbers<[1], [0], [0], [1], [0, 0, 1, 1], [], []>} : vector<16x32xf32>, vector<32x96xf32>, vector<16x96xf32> -> vector<16x96xf32>
    %96 = vector.broadcast %74 : vector<1x96xf32> to vector<16x96xf32>
    %97 = arith.addf %95, %96 : vector<16x96xf32>
    %98 = vector.extract_strided_slice %97 {offsets = [0, 0], sizes = [16, 8], strides = [1, 1]} : vector<16x96xf32> to vector<16x8xf32>
    %99 = vector.extract_strided_slice %97 {offsets = [0, 32], sizes = [16, 8], strides = [1, 1]} : vector<16x96xf32> to vector<16x8xf32>
    %100 = vector.extract_strided_slice %97 {offsets = [0, 64], sizes = [16, 8], strides = [1, 1]} : vector<16x96xf32> to vector<16x8xf32>
    %cst_63 = arith.constant dense<0.000000e+00> : vector<16x16xf32>
    %101 = tpu.matmul %98, %99, %cst_63 {dimension_numbers = #tpu.dot_dimension_numbers<[1], [1], [0], [0], [0, 0, 1, 0], [], []>} : vector<16x8xf32>, vector<16x8xf32>, vector<16x16xf32> -> vector<16x16xf32>
    %cst_64 = arith.constant 0.353553385 : f32
    %102 = vector.broadcast %cst_64 : f32 to vector<16x16xf32>
    %103 = arith.mulf %101, %102 : vector<16x16xf32>
    %104 = arith.addf %103, %70 : vector<16x16xf32>
    %cst_65 = arith.constant dense<0xFF800000> : vector<16xf32>
    %105 = vector.multi_reduction <maximumf>, %104, %cst_65 [1] : vector<16x16xf32> to vector<16xf32>
    %106 = vector.shape_cast %105 : vector<16xf32> to vector<16x1xf32>
    %107 = vector.broadcast %106 : vector<16x1xf32> to vector<16x16xf32>
    %108 = arith.subf %104, %107 : vector<16x16xf32>
    %109 = math.exp %108 : vector<16x16xf32>
    %cst_66 = arith.constant dense<0.000000e+00> : vector<16xf32>
    %110 = vector.multi_reduction <add>, %109, %cst_66 [1] : vector<16x16xf32> to vector<16xf32>
    %111 = vector.shape_cast %110 : vector<16xf32> to vector<16x1xf32>
    %112 = vector.broadcast %111 : vector<16x1xf32> to vector<16x16xf32>
    %113 = arith.divf %109, %112 : vector<16x16xf32>
    %cst_67 = arith.constant dense<0.000000e+00> : vector<16x8xf32>
    %114 = tpu.matmul %113, %100, %cst_67 {dimension_numbers = #tpu.dot_dimension_numbers<[1], [0], [0], [1], [0, 0, 1, 1], [], []>} : vector<16x16xf32>, vector<16x8xf32>, vector<16x8xf32> -> vector<16x8xf32>
    %115 = vector.extract_strided_slice %97 {offsets = [0, 8], sizes = [16, 8], strides = [1, 1]} : vector<16x96xf32> to vector<16x8xf32>
    %116 = vector.extract_strided_slice %97 {offsets = [0, 40], sizes = [16, 8], strides = [1, 1]} : vector<16x96xf32> to vector<16x8xf32>
    %117 = vector.extract_strided_slice %97 {offsets = [0, 72], sizes = [16, 8], strides = [1, 1]} : vector<16x96xf32> to vector<16x8xf32>
    %cst_68 = arith.constant dense<0.000000e+00> : vector<16x16xf32>
    %118 = tpu.matmul %115, %116, %cst_68 {dimension_numbers = #tpu.dot_dimension_numbers<[1], [1], [0], [0], [0, 0, 1, 0], [], []>} : vector<16x8xf32>, vector<16x8xf32>, vector<16x16xf32> -> vector<16x16xf32>
    %cst_69 = arith.constant 0.353553385 : f32
    %119 = vector.broadcast %cst_69 : f32 to vector<16x16xf32>
    %120 = arith.mulf %118, %119 : vector<16x16xf32>
    %121 = arith.addf %120, %70 : vector<16x16xf32>
    %cst_70 = arith.constant dense<0xFF800000> : vector<16xf32>
    %122 = vector.multi_reduction <maximumf>, %121, %cst_70 [1] : vector<16x16xf32> to vector<16xf32>
    %123 = vector.shape_cast %122 : vector<16xf32> to vector<16x1xf32>
    %124 = vector.broadcast %123 : vector<16x1xf32> to vector<16x16xf32>
    %125 = arith.subf %121, %124 : vector<16x16xf32>
    %126 = math.exp %125 : vector<16x16xf32>
    %cst_71 = arith.constant dense<0.000000e+00> : vector<16xf32>
    %127 = vector.multi_reduction <add>, %126, %cst_71 [1] : vector<16x16xf32> to vector<16xf32>
    %128 = vector.shape_cast %127 : vector<16xf32> to vector<16x1xf32>
    %129 = vector.broadcast %128 : vector<16x1xf32> to vector<16x16xf32>
    %130 = arith.divf %126, %129 : vector<16x16xf32>
    %cst_72 = arith.constant dense<0.000000e+00> : vector<16x8xf32>
    %131 = tpu.matmul %130, %117, %cst_72 {dimension_numbers = #tpu.dot_dimension_numbers<[1], [0], [0], [1], [0, 0, 1, 1], [], []>} : vector<16x16xf32>, vector<16x8xf32>, vector<16x8xf32> -> vector<16x8xf32>
    %132 = vector.extract_strided_slice %97 {offsets = [0, 16], sizes = [16, 8], strides = [1, 1]} : vector<16x96xf32> to vector<16x8xf32>
    %133 = vector.extract_strided_slice %97 {offsets = [0, 48], sizes = [16, 8], strides = [1, 1]} : vector<16x96xf32> to vector<16x8xf32>
    %134 = vector.extract_strided_slice %97 {offsets = [0, 80], sizes = [16, 8], strides = [1, 1]} : vector<16x96xf32> to vector<16x8xf32>
    %cst_73 = arith.constant dense<0.000000e+00> : vector<16x16xf32>
    %135 = tpu.matmul %132, %133, %cst_73 {dimension_numbers = #tpu.dot_dimension_numbers<[1], [1], [0], [0], [0, 0, 1, 0], [], []>} : vector<16x8xf32>, vector<16x8xf32>, vector<16x16xf32> -> vector<16x16xf32>
    %cst_74 = arith.constant 0.353553385 : f32
    %136 = vector.broadcast %cst_74 : f32 to vector<16x16xf32>
    %137 = arith.mulf %135, %136 : vector<16x16xf32>
    %138 = arith.addf %137, %70 : vector<16x16xf32>
    %cst_75 = arith.constant dense<0xFF800000> : vector<16xf32>
    %139 = vector.multi_reduction <maximumf>, %138, %cst_75 [1] : vector<16x16xf32> to vector<16xf32>
    %140 = vector.shape_cast %139 : vector<16xf32> to vector<16x1xf32>
    %141 = vector.broadcast %140 : vector<16x1xf32> to vector<16x16xf32>
    %142 = arith.subf %138, %141 : vector<16x16xf32>
    %143 = math.exp %142 : vector<16x16xf32>
    %cst_76 = arith.constant dense<0.000000e+00> : vector<16xf32>
    %144 = vector.multi_reduction <add>, %143, %cst_76 [1] : vector<16x16xf32> to vector<16xf32>
    %145 = vector.shape_cast %144 : vector<16xf32> to vector<16x1xf32>
    %146 = vector.broadcast %145 : vector<16x1xf32> to vector<16x16xf32>
    %147 = arith.divf %143, %146 : vector<16x16xf32>
    %cst_77 = arith.constant dense<0.000000e+00> : vector<16x8xf32>
    %148 = tpu.matmul %147, %134, %cst_77 {dimension_numbers = #tpu.dot_dimension_numbers<[1], [0], [0], [1], [0, 0, 1, 1], [], []>} : vector<16x16xf32>, vector<16x8xf32>, vector<16x8xf32> -> vector<16x8xf32>
    %149 = vector.extract_strided_slice %97 {offsets = [0, 24], sizes = [16, 8], strides = [1, 1]} : vector<16x96xf32> to vector<16x8xf32>
    %150 = vector.extract_strided_slice %97 {offsets = [0, 56], sizes = [16, 8], strides = [1, 1]} : vector<16x96xf32> to vector<16x8xf32>
    %151 = vector.extract_strided_slice %97 {offsets = [0, 88], sizes = [16, 8], strides = [1, 1]} : vector<16x96xf32> to vector<16x8xf32>
    %cst_78 = arith.constant dense<0.000000e+00> : vector<16x16xf32>
    %152 = tpu.matmul %149, %150, %cst_78 {dimension_numbers = #tpu.dot_dimension_numbers<[1], [1], [0], [0], [0, 0, 1, 0], [], []>} : vector<16x8xf32>, vector<16x8xf32>, vector<16x16xf32> -> vector<16x16xf32>
    %cst_79 = arith.constant 0.353553385 : f32
    %153 = vector.broadcast %cst_79 : f32 to vector<16x16xf32>
    %154 = arith.mulf %152, %153 : vector<16x16xf32>
    %155 = arith.addf %154, %70 : vector<16x16xf32>
    %cst_80 = arith.constant dense<0xFF800000> : vector<16xf32>
    %156 = vector.multi_reduction <maximumf>, %155, %cst_80 [1] : vector<16x16xf32> to vector<16xf32>
    %157 = vector.shape_cast %156 : vector<16xf32> to vector<16x1xf32>
    %158 = vector.broadcast %157 : vector<16x1xf32> to vector<16x16xf32>
    %159 = arith.subf %155, %158 : vector<16x16xf32>
    %160 = math.exp %159 : vector<16x16xf32>
    %cst_81 = arith.constant dense<0.000000e+00> : vector<16xf32>
    %161 = vector.multi_reduction <add>, %160, %cst_81 [1] : vector<16x16xf32> to vector<16xf32>
    %162 = vector.shape_cast %161 : vector<16xf32> to vector<16x1xf32>
    %163 = vector.broadcast %162 : vector<16x1xf32> to vector<16x16xf32>
    %164 = arith.divf %160, %163 : vector<16x16xf32>
    %cst_82 = arith.constant dense<0.000000e+00> : vector<16x8xf32>
    %165 = tpu.matmul %164, %151, %cst_82 {dimension_numbers = #tpu.dot_dimension_numbers<[1], [0], [0], [1], [0, 0, 1, 1], [], []>} : vector<16x16xf32>, vector<16x8xf32>, vector<16x8xf32> -> vector<16x8xf32>
    %166 = tpu.concatenate %114, %131, %148, %165 in 1 : vector<16x8xf32>, vector<16x8xf32>, vector<16x8xf32>, vector<16x8xf32> -> vector<16x32xf32>
    %cst_83 = arith.constant dense<0.000000e+00> : vector<16x32xf32>
    %167 = tpu.matmul %166, %76, %cst_83 {dimension_numbers = #tpu.dot_dimension_numbers<[1], [0], [0], [1], [0, 0, 1, 1], [], []>} : vector<16x32xf32>, vector<32x32xf32>, vector<16x32xf32> -> vector<16x32xf32>
    %168 = vector.broadcast %78 : vector<1x32xf32> to vector<16x32xf32>
    %169 = arith.addf %167, %168 : vector<16x32xf32>
    %170 = arith.addf %37, %169 : vector<16x32xf32>
    %cst_84 = arith.constant dense<0.000000e+00> : vector<16xf32>
    %171 = vector.multi_reduction <add>, %170, %cst_84 [1] : vector<16x32xf32> to vector<16xf32>
    %172 = vector.shape_cast %171 : vector<16xf32> to vector<16x1xf32>
    %cst_85 = arith.constant 3.200000e+01 : f32
    %173 = vector.broadcast %cst_85 : f32 to vector<16x1xf32>
    %174 = arith.divf %172, %173 : vector<16x1xf32>
    %175 = vector.broadcast %174 : vector<16x1xf32> to vector<16x32xf32>
    %176 = arith.subf %170, %175 : vector<16x32xf32>
    %177 = arith.mulf %176, %176 : vector<16x32xf32>
    %cst_86 = arith.constant dense<0.000000e+00> : vector<16xf32>
    %178 = vector.multi_reduction <add>, %177, %cst_86 [1] : vector<16x32xf32> to vector<16xf32>
    %179 = vector.shape_cast %178 : vector<16xf32> to vector<16x1xf32>
    %cst_87 = arith.constant 3.200000e+01 : f32
    %180 = vector.broadcast %cst_87 : f32 to vector<16x1xf32>
    %181 = arith.divf %179, %180 : vector<16x1xf32>
    %182 = vector.broadcast %174 : vector<16x1xf32> to vector<16x32xf32>
    %183 = arith.subf %170, %182 : vector<16x32xf32>
    %cst_88 = arith.constant 9.99999996E-13 : f32
    %184 = vector.broadcast %cst_88 : f32 to vector<16x1xf32>
    %185 = arith.addf %181, %184 : vector<16x1xf32>
    %186 = math.rsqrt %185 : vector<16x1xf32>
    %187 = vector.broadcast %186 : vector<16x1xf32> to vector<16x32xf32>
    %188 = arith.mulf %183, %187 : vector<16x32xf32>
    %189 = vector.broadcast %80 : vector<1x32xf32> to vector<16x32xf32>
    %190 = arith.mulf %188, %189 : vector<16x32xf32>
    %191 = vector.broadcast %82 : vector<1x32xf32> to vector<16x32xf32>
    %192 = arith.addf %190, %191 : vector<16x32xf32>
    %cst_89 = arith.constant dense<0.000000e+00> : vector<16x64xf32>
    %193 = tpu.matmul %192, %84, %cst_89 {dimension_numbers = #tpu.dot_dimension_numbers<[1], [0], [0], [1], [0, 0, 1, 1], [], []>} : vector<16x32xf32>, vector<32x64xf32>, vector<16x64xf32> -> vector<16x64xf32>
    %194 = vector.broadcast %86 : vector<1x64xf32> to vector<16x64xf32>
    %195 = arith.addf %193, %194 : vector<16x64xf32>
    %196 = arith.mulf %195, %195 : vector<16x64xf32>
    %197 = arith.mulf %195, %196 : vector<16x64xf32>
    %cst_90 = arith.constant 4.471500e-02 : f32
    %198 = vector.broadcast %cst_90 : f32 to vector<16x64xf32>
    %199 = arith.mulf %198, %197 : vector<16x64xf32>
    %200 = arith.addf %195, %199 : vector<16x64xf32>
    %cst_91 = arith.constant 0.797884583 : f32
    %201 = vector.broadcast %cst_91 : f32 to vector<16x64xf32>
    %202 = arith.mulf %201, %200 : vector<16x64xf32>
    %203 = math.tanh %202 : vector<16x64xf32>
    %cst_92 = arith.constant 1.000000e+00 : f32
    %204 = vector.broadcast %cst_92 : f32 to vector<16x64xf32>
    %205 = arith.addf %204, %203 : vector<16x64xf32>
    %cst_93 = arith.constant 5.000000e-01 : f32
    %206 = vector.broadcast %cst_93 : f32 to vector<16x64xf32>
    %207 = arith.mulf %206, %205 : vector<16x64xf32>
    %208 = arith.mulf %195, %207 : vector<16x64xf32>
    %cst_94 = arith.constant dense<0.000000e+00> : vector<16x32xf32>
    %209 = tpu.matmul %208, %88, %cst_94 {dimension_numbers = #tpu.dot_dimension_numbers<[1], [0], [0], [1], [0, 0, 1, 1], [], []>} : vector<16x64xf32>, vector<64x32xf32>, vector<16x32xf32> -> vector<16x32xf32>
    %210 = vector.broadcast %90 : vector<1x32xf32> to vector<16x32xf32>
    %211 = arith.addf %209, %210 : vector<16x32xf32>
    %212 = arith.addf %192, %211 : vector<16x32xf32>
    %cst_95 = arith.constant dense<0.000000e+00> : vector<16xf32>
    %213 = vector.multi_reduction <add>, %212, %cst_95 [1] : vector<16x32xf32> to vector<16xf32>
    %214 = vector.shape_cast %213 : vector<16xf32> to vector<16x1xf32>
    %cst_96 = arith.constant 3.200000e+01 : f32
    %215 = vector.broadcast %cst_96 : f32 to vector<16x1xf32>
    %216 = arith.divf %214, %215 : vector<16x1xf32>
    %217 = vector.broadcast %216 : vector<16x1xf32> to vector<16x32xf32>
    %218 = arith.subf %212, %217 : vector<16x32xf32>
    %219 = arith.mulf %218, %218 : vector<16x32xf32>
    %cst_97 = arith.constant dense<0.000000e+00> : vector<16xf32>
    %220 = vector.multi_reduction <add>, %219, %cst_97 [1] : vector<16x32xf32> to vector<16xf32>
    %221 = vector.shape_cast %220 : vector<16xf32> to vector<16x1xf32>
    %cst_98 = arith.constant 3.200000e+01 : f32
    %222 = vector.broadcast %cst_98 : f32 to vector<16x1xf32>
    %223 = arith.divf %221, %222 : vector<16x1xf32>
    %224 = vector.broadcast %216 : vector<16x1xf32> to vector<16x32xf32>
    %225 = arith.subf %212, %224 : vector<16x32xf32>
    %cst_99 = arith.constant 9.99999996E-13 : f32
    %226 = vector.broadcast %cst_99 : f32 to vector<16x1xf32>
    %227 = arith.addf %223, %226 : vector<16x1xf32>
    %228 = math.rsqrt %227 : vector<16x1xf32>
    %229 = vector.broadcast %228 : vector<16x1xf32> to vector<16x32xf32>
    %230 = arith.mulf %225, %229 : vector<16x32xf32>
    %231 = vector.broadcast %92 : vector<1x32xf32> to vector<16x32xf32>
    %232 = arith.mulf %230, %231 : vector<16x32xf32>
    %233 = vector.broadcast %94 : vector<1x32xf32> to vector<16x32xf32>
    %234 = arith.addf %232, %233 : vector<16x32xf32>
    %c1 = arith.constant 1 : index
    %c0_100 = arith.constant 0 : index
    %c0_101 = arith.constant 0 : index
    %235 = vector.load %arg7[%c1, %c0_100, %c0_101] : memref<2x32x96xf32, #tpu.memory_space<vmem>>, vector<1x32x96xf32>
    %236 = vector.shape_cast %235 : vector<1x32x96xf32> to vector<32x96xf32>
    %c1_102 = arith.constant 1 : index
    %c0_103 = arith.constant 0 : index
    %c0_104 = arith.constant 0 : index
    %237 = vector.load %arg8[%c1_102, %c0_103, %c0_104] : memref<2x1x96xf32, #tpu.memory_space<vmem>>, vector<1x1x96xf32>
    %238 = vector.shape_cast %237 : vector<1x1x96xf32> to vector<1x96xf32>
    %c1_105 = arith.constant 1 : index
    %c0_106 = arith.constant 0 : index
    %c0_107 = arith.constant 0 : index
    %239 = vector.load %arg9[%c1_105, %c0_106, %c0_107] : memref<2x32x32xf32, #tpu.memory_space<vmem>>, vector<1x32x32xf32>
    %240 = vector.shape_cast %239 : vector<1x32x32xf32> to vector<32x32xf32>
    %c1_108 = arith.constant 1 : index
    %c0_109 = arith.constant 0 : index
    %c0_110 = arith.constant 0 : index
    %241 = vector.load %arg10[%c1_108, %c0_109, %c0_110] : memref<2x1x32xf32, #tpu.memory_space<vmem>>, vector<1x1x32xf32>
    %242 = vector.shape_cast %241 : vector<1x1x32xf32> to vector<1x32xf32>
    %c1_111 = arith.constant 1 : index
    %c0_112 = arith.constant 0 : index
    %c0_113 = arith.constant 0 : index
    %243 = vector.load %arg11[%c1_111, %c0_112, %c0_113] : memref<2x1x32xf32, #tpu.memory_space<vmem>>, vector<1x1x32xf32>
    %244 = vector.shape_cast %243 : vector<1x1x32xf32> to vector<1x32xf32>
    %c1_114 = arith.constant 1 : index
    %c0_115 = arith.constant 0 : index
    %c0_116 = arith.constant 0 : index
    %245 = vector.load %arg12[%c1_114, %c0_115, %c0_116] : memref<2x1x32xf32, #tpu.memory_space<vmem>>, vector<1x1x32xf32>
    %246 = vector.shape_cast %245 : vector<1x1x32xf32> to vector<1x32xf32>
    %c1_117 = arith.constant 1 : index
    %c0_118 = arith.constant 0 : index
    %c0_119 = arith.constant 0 : index
    %247 = vector.load %arg13[%c1_117, %c0_118, %c0_119] : memref<2x32x64xf32, #tpu.memory_space<vmem>>, vector<1x32x64xf32>
    %248 = vector.shape_cast %247 : vector<1x32x64xf32> to vector<32x64xf32>
    %c1_120 = arith.constant 1 : index
    %c0_121 = arith.constant 0 : index
    %c0_122 = arith.constant 0 : index
    %249 = vector.load %arg14[%c1_120, %c0_121, %c0_122] : memref<2x1x64xf32, #tpu.memory_space<vmem>>, vector<1x1x64xf32>
    %250 = vector.shape_cast %249 : vector<1x1x64xf32> to vector<1x64xf32>
    %c1_123 = arith.constant 1 : index
    %c0_124 = arith.constant 0 : index
    %c0_125 = arith.constant 0 : index
    %251 = vector.load %arg15[%c1_123, %c0_124, %c0_125] : memref<2x64x32xf32, #tpu.memory_space<vmem>>, vector<1x64x32xf32>
    %252 = vector.shape_cast %251 : vector<1x64x32xf32> to vector<64x32xf32>
    %c1_126 = arith.constant 1 : index
    %c0_127 = arith.constant 0 : index
    %c0_128 = arith.constant 0 : index
    %253 = vector.load %arg16[%c1_126, %c0_127, %c0_128] : memref<2x1x32xf32, #tpu.memory_space<vmem>>, vector<1x1x32xf32>
    %254 = vector.shape_cast %253 : vector<1x1x32xf32> to vector<1x32xf32>
    %c1_129 = arith.constant 1 : index
    %c0_130 = arith.constant 0 : index
    %c0_131 = arith.constant 0 : index
    %255 = vector.load %arg17[%c1_129, %c0_130, %c0_131] : memref<2x1x32xf32, #tpu.memory_space<vmem>>, vector<1x1x32xf32>
    %256 = vector.shape_cast %255 : vector<1x1x32xf32> to vector<1x32xf32>
    %c1_132 = arith.constant 1 : index
    %c0_133 = arith.constant 0 : index
    %c0_134 = arith.constant 0 : index
    %257 = vector.load %arg18[%c1_132, %c0_133, %c0_134] : memref<2x1x32xf32, #tpu.memory_space<vmem>>, vector<1x1x32xf32>
    %258 = vector.shape_cast %257 : vector<1x1x32xf32> to vector<1x32xf32>
    %cst_135 = arith.constant dense<0.000000e+00> : vector<16x96xf32>
    %259 = tpu.matmul %234, %236, %cst_135 {dimension_numbers = #tpu.dot_dimension_numbers<[1], [0], [0], [1], [0, 0, 1, 1], [], []>} : vector<16x32xf32>, vector<32x96xf32>, vector<16x96xf32> -> vector<16x96xf32>
    %260 = vector.broadcast %238 : vector<1x96xf32> to vector<16x96xf32>
    %261 = arith.addf %259, %260 : vector<16x96xf32>
    %262 = vector.extract_strided_slice %261 {offsets = [0, 0], sizes = [16, 8], strides = [1, 1]} : vector<16x96xf32> to vector<16x8xf32>
    %263 = vector.extract_strided_slice %261 {offsets = [0, 32], sizes = [16, 8], strides = [1, 1]} : vector<16x96xf32> to vector<16x8xf32>
    %264 = vector.extract_strided_slice %261 {offsets = [0, 64], sizes = [16, 8], strides = [1, 1]} : vector<16x96xf32> to vector<16x8xf32>
    %cst_136 = arith.constant dense<0.000000e+00> : vector<16x16xf32>
    %265 = tpu.matmul %262, %263, %cst_136 {dimension_numbers = #tpu.dot_dimension_numbers<[1], [1], [0], [0], [0, 0, 1, 0], [], []>} : vector<16x8xf32>, vector<16x8xf32>, vector<16x16xf32> -> vector<16x16xf32>
    %cst_137 = arith.constant 0.353553385 : f32
    %266 = vector.broadcast %cst_137 : f32 to vector<16x16xf32>
    %267 = arith.mulf %265, %266 : vector<16x16xf32>
    %268 = arith.addf %267, %70 : vector<16x16xf32>
    %cst_138 = arith.constant dense<0xFF800000> : vector<16xf32>
    %269 = vector.multi_reduction <maximumf>, %268, %cst_138 [1] : vector<16x16xf32> to vector<16xf32>
    %270 = vector.shape_cast %269 : vector<16xf32> to vector<16x1xf32>
    %271 = vector.broadcast %270 : vector<16x1xf32> to vector<16x16xf32>
    %272 = arith.subf %268, %271 : vector<16x16xf32>
    %273 = math.exp %272 : vector<16x16xf32>
    %cst_139 = arith.constant dense<0.000000e+00> : vector<16xf32>
    %274 = vector.multi_reduction <add>, %273, %cst_139 [1] : vector<16x16xf32> to vector<16xf32>
    %275 = vector.shape_cast %274 : vector<16xf32> to vector<16x1xf32>
    %276 = vector.broadcast %275 : vector<16x1xf32> to vector<16x16xf32>
    %277 = arith.divf %273, %276 : vector<16x16xf32>
    %cst_140 = arith.constant dense<0.000000e+00> : vector<16x8xf32>
    %278 = tpu.matmul %277, %264, %cst_140 {dimension_numbers = #tpu.dot_dimension_numbers<[1], [0], [0], [1], [0, 0, 1, 1], [], []>} : vector<16x16xf32>, vector<16x8xf32>, vector<16x8xf32> -> vector<16x8xf32>
    %279 = vector.extract_strided_slice %261 {offsets = [0, 8], sizes = [16, 8], strides = [1, 1]} : vector<16x96xf32> to vector<16x8xf32>
    %280 = vector.extract_strided_slice %261 {offsets = [0, 40], sizes = [16, 8], strides = [1, 1]} : vector<16x96xf32> to vector<16x8xf32>
    %281 = vector.extract_strided_slice %261 {offsets = [0, 72], sizes = [16, 8], strides = [1, 1]} : vector<16x96xf32> to vector<16x8xf32>
    %cst_141 = arith.constant dense<0.000000e+00> : vector<16x16xf32>
    %282 = tpu.matmul %279, %280, %cst_141 {dimension_numbers = #tpu.dot_dimension_numbers<[1], [1], [0], [0], [0, 0, 1, 0], [], []>} : vector<16x8xf32>, vector<16x8xf32>, vector<16x16xf32> -> vector<16x16xf32>
    %cst_142 = arith.constant 0.353553385 : f32
    %283 = vector.broadcast %cst_142 : f32 to vector<16x16xf32>
    %284 = arith.mulf %282, %283 : vector<16x16xf32>
    %285 = arith.addf %284, %70 : vector<16x16xf32>
    %cst_143 = arith.constant dense<0xFF800000> : vector<16xf32>
    %286 = vector.multi_reduction <maximumf>, %285, %cst_143 [1] : vector<16x16xf32> to vector<16xf32>
    %287 = vector.shape_cast %286 : vector<16xf32> to vector<16x1xf32>
    %288 = vector.broadcast %287 : vector<16x1xf32> to vector<16x16xf32>
    %289 = arith.subf %285, %288 : vector<16x16xf32>
    %290 = math.exp %289 : vector<16x16xf32>
    %cst_144 = arith.constant dense<0.000000e+00> : vector<16xf32>
    %291 = vector.multi_reduction <add>, %290, %cst_144 [1] : vector<16x16xf32> to vector<16xf32>
    %292 = vector.shape_cast %291 : vector<16xf32> to vector<16x1xf32>
    %293 = vector.broadcast %292 : vector<16x1xf32> to vector<16x16xf32>
    %294 = arith.divf %290, %293 : vector<16x16xf32>
    %cst_145 = arith.constant dense<0.000000e+00> : vector<16x8xf32>
    %295 = tpu.matmul %294, %281, %cst_145 {dimension_numbers = #tpu.dot_dimension_numbers<[1], [0], [0], [1], [0, 0, 1, 1], [], []>} : vector<16x16xf32>, vector<16x8xf32>, vector<16x8xf32> -> vector<16x8xf32>
    %296 = vector.extract_strided_slice %261 {offsets = [0, 16], sizes = [16, 8], strides = [1, 1]} : vector<16x96xf32> to vector<16x8xf32>
    %297 = vector.extract_strided_slice %261 {offsets = [0, 48], sizes = [16, 8], strides = [1, 1]} : vector<16x96xf32> to vector<16x8xf32>
    %298 = vector.extract_strided_slice %261 {offsets = [0, 80], sizes = [16, 8], strides = [1, 1]} : vector<16x96xf32> to vector<16x8xf32>
    %cst_146 = arith.constant dense<0.000000e+00> : vector<16x16xf32>
    %299 = tpu.matmul %296, %297, %cst_146 {dimension_numbers = #tpu.dot_dimension_numbers<[1], [1], [0], [0], [0, 0, 1, 0], [], []>} : vector<16x8xf32>, vector<16x8xf32>, vector<16x16xf32> -> vector<16x16xf32>
    %cst_147 = arith.constant 0.353553385 : f32
    %300 = vector.broadcast %cst_147 : f32 to vector<16x16xf32>
    %301 = arith.mulf %299, %300 : vector<16x16xf32>
    %302 = arith.addf %301, %70 : vector<16x16xf32>
    %cst_148 = arith.constant dense<0xFF800000> : vector<16xf32>
    %303 = vector.multi_reduction <maximumf>, %302, %cst_148 [1] : vector<16x16xf32> to vector<16xf32>
    %304 = vector.shape_cast %303 : vector<16xf32> to vector<16x1xf32>
    %305 = vector.broadcast %304 : vector<16x1xf32> to vector<16x16xf32>
    %306 = arith.subf %302, %305 : vector<16x16xf32>
    %307 = math.exp %306 : vector<16x16xf32>
    %cst_149 = arith.constant dense<0.000000e+00> : vector<16xf32>
    %308 = vector.multi_reduction <add>, %307, %cst_149 [1] : vector<16x16xf32> to vector<16xf32>
    %309 = vector.shape_cast %308 : vector<16xf32> to vector<16x1xf32>
    %310 = vector.broadcast %309 : vector<16x1xf32> to vector<16x16xf32>
    %311 = arith.divf %307, %310 : vector<16x16xf32>
    %cst_150 = arith.constant dense<0.000000e+00> : vector<16x8xf32>
    %312 = tpu.matmul %311, %298, %cst_150 {dimension_numbers = #tpu.dot_dimension_numbers<[1], [0], [0], [1], [0, 0, 1, 1], [], []>} : vector<16x16xf32>, vector<16x8xf32>, vector<16x8xf32> -> vector<16x8xf32>
    %313 = vector.extract_strided_slice %261 {offsets = [0, 24], sizes = [16, 8], strides = [1, 1]} : vector<16x96xf32> to vector<16x8xf32>
    %314 = vector.extract_strided_slice %261 {offsets = [0, 56], sizes = [16, 8], strides = [1, 1]} : vector<16x96xf32> to vector<16x8xf32>
    %315 = vector.extract_strided_slice %261 {offsets = [0, 88], sizes = [16, 8], strides = [1, 1]} : vector<16x96xf32> to vector<16x8xf32>
    %cst_151 = arith.constant dense<0.000000e+00> : vector<16x16xf32>
    %316 = tpu.matmul %313, %314, %cst_151 {dimension_numbers = #tpu.dot_dimension_numbers<[1], [1], [0], [0], [0, 0, 1, 0], [], []>} : vector<16x8xf32>, vector<16x8xf32>, vector<16x16xf32> -> vector<16x16xf32>
    %cst_152 = arith.constant 0.353553385 : f32
    %317 = vector.broadcast %cst_152 : f32 to vector<16x16xf32>
    %318 = arith.mulf %316, %317 : vector<16x16xf32>
    %319 = arith.addf %318, %70 : vector<16x16xf32>
    %cst_153 = arith.constant dense<0xFF800000> : vector<16xf32>
    %320 = vector.multi_reduction <maximumf>, %319, %cst_153 [1] : vector<16x16xf32> to vector<16xf32>
    %321 = vector.shape_cast %320 : vector<16xf32> to vector<16x1xf32>
    %322 = vector.broadcast %321 : vector<16x1xf32> to vector<16x16xf32>
    %323 = arith.subf %319, %322 : vector<16x16xf32>
    %324 = math.exp %323 : vector<16x16xf32>
    %cst_154 = arith.constant dense<0.000000e+00> : vector<16xf32>
    %325 = vector.multi_reduction <add>, %324, %cst_154 [1] : vector<16x16xf32> to vector<16xf32>
    %326 = vector.shape_cast %325 : vector<16xf32> to vector<16x1xf32>
    %327 = vector.broadcast %326 : vector<16x1xf32> to vector<16x16xf32>
    %328 = arith.divf %324, %327 : vector<16x16xf32>
    %cst_155 = arith.constant dense<0.000000e+00> : vector<16x8xf32>
    %329 = tpu.matmul %328, %315, %cst_155 {dimension_numbers = #tpu.dot_dimension_numbers<[1], [0], [0], [1], [0, 0, 1, 1], [], []>} : vector<16x16xf32>, vector<16x8xf32>, vector<16x8xf32> -> vector<16x8xf32>
    %330 = tpu.concatenate %278, %295, %312, %329 in 1 : vector<16x8xf32>, vector<16x8xf32>, vector<16x8xf32>, vector<16x8xf32> -> vector<16x32xf32>
    %cst_156 = arith.constant dense<0.000000e+00> : vector<16x32xf32>
    %331 = tpu.matmul %330, %240, %cst_156 {dimension_numbers = #tpu.dot_dimension_numbers<[1], [0], [0], [1], [0, 0, 1, 1], [], []>} : vector<16x32xf32>, vector<32x32xf32>, vector<16x32xf32> -> vector<16x32xf32>
    %332 = vector.broadcast %242 : vector<1x32xf32> to vector<16x32xf32>
    %333 = arith.addf %331, %332 : vector<16x32xf32>
    %334 = arith.addf %234, %333 : vector<16x32xf32>
    %cst_157 = arith.constant dense<0.000000e+00> : vector<16xf32>
    %335 = vector.multi_reduction <add>, %334, %cst_157 [1] : vector<16x32xf32> to vector<16xf32>
    %336 = vector.shape_cast %335 : vector<16xf32> to vector<16x1xf32>
    %cst_158 = arith.constant 3.200000e+01 : f32
    %337 = vector.broadcast %cst_158 : f32 to vector<16x1xf32>
    %338 = arith.divf %336, %337 : vector<16x1xf32>
    %339 = vector.broadcast %338 : vector<16x1xf32> to vector<16x32xf32>
    %340 = arith.subf %334, %339 : vector<16x32xf32>
    %341 = arith.mulf %340, %340 : vector<16x32xf32>
    %cst_159 = arith.constant dense<0.000000e+00> : vector<16xf32>
    %342 = vector.multi_reduction <add>, %341, %cst_159 [1] : vector<16x32xf32> to vector<16xf32>
    %343 = vector.shape_cast %342 : vector<16xf32> to vector<16x1xf32>
    %cst_160 = arith.constant 3.200000e+01 : f32
    %344 = vector.broadcast %cst_160 : f32 to vector<16x1xf32>
    %345 = arith.divf %343, %344 : vector<16x1xf32>
    %346 = vector.broadcast %338 : vector<16x1xf32> to vector<16x32xf32>
    %347 = arith.subf %334, %346 : vector<16x32xf32>
    %cst_161 = arith.constant 9.99999996E-13 : f32
    %348 = vector.broadcast %cst_161 : f32 to vector<16x1xf32>
    %349 = arith.addf %345, %348 : vector<16x1xf32>
    %350 = math.rsqrt %349 : vector<16x1xf32>
    %351 = vector.broadcast %350 : vector<16x1xf32> to vector<16x32xf32>
    %352 = arith.mulf %347, %351 : vector<16x32xf32>
    %353 = vector.broadcast %244 : vector<1x32xf32> to vector<16x32xf32>
    %354 = arith.mulf %352, %353 : vector<16x32xf32>
    %355 = vector.broadcast %246 : vector<1x32xf32> to vector<16x32xf32>
    %356 = arith.addf %354, %355 : vector<16x32xf32>
    %cst_162 = arith.constant dense<0.000000e+00> : vector<16x64xf32>
    %357 = tpu.matmul %356, %248, %cst_162 {dimension_numbers = #tpu.dot_dimension_numbers<[1], [0], [0], [1], [0, 0, 1, 1], [], []>} : vector<16x32xf32>, vector<32x64xf32>, vector<16x64xf32> -> vector<16x64xf32>
    %358 = vector.broadcast %250 : vector<1x64xf32> to vector<16x64xf32>
    %359 = arith.addf %357, %358 : vector<16x64xf32>
    %360 = arith.mulf %359, %359 : vector<16x64xf32>
    %361 = arith.mulf %359, %360 : vector<16x64xf32>
    %cst_163 = arith.constant 4.471500e-02 : f32
    %362 = vector.broadcast %cst_163 : f32 to vector<16x64xf32>
    %363 = arith.mulf %362, %361 : vector<16x64xf32>
    %364 = arith.addf %359, %363 : vector<16x64xf32>
    %cst_164 = arith.constant 0.797884583 : f32
    %365 = vector.broadcast %cst_164 : f32 to vector<16x64xf32>
    %366 = arith.mulf %365, %364 : vector<16x64xf32>
    %367 = math.tanh %366 : vector<16x64xf32>
    %cst_165 = arith.constant 1.000000e+00 : f32
    %368 = vector.broadcast %cst_165 : f32 to vector<16x64xf32>
    %369 = arith.addf %368, %367 : vector<16x64xf32>
    %cst_166 = arith.constant 5.000000e-01 : f32
    %370 = vector.broadcast %cst_166 : f32 to vector<16x64xf32>
    %371 = arith.mulf %370, %369 : vector<16x64xf32>
    %372 = arith.mulf %359, %371 : vector<16x64xf32>
    %cst_167 = arith.constant dense<0.000000e+00> : vector<16x32xf32>
    %373 = tpu.matmul %372, %252, %cst_167 {dimension_numbers = #tpu.dot_dimension_numbers<[1], [0], [0], [1], [0, 0, 1, 1], [], []>} : vector<16x64xf32>, vector<64x32xf32>, vector<16x32xf32> -> vector<16x32xf32>
    %374 = vector.broadcast %254 : vector<1x32xf32> to vector<16x32xf32>
    %375 = arith.addf %373, %374 : vector<16x32xf32>
    %376 = arith.addf %356, %375 : vector<16x32xf32>
    %cst_168 = arith.constant dense<0.000000e+00> : vector<16xf32>
    %377 = vector.multi_reduction <add>, %376, %cst_168 [1] : vector<16x32xf32> to vector<16xf32>
    %378 = vector.shape_cast %377 : vector<16xf32> to vector<16x1xf32>
    %cst_169 = arith.constant 3.200000e+01 : f32
    %379 = vector.broadcast %cst_169 : f32 to vector<16x1xf32>
    %380 = arith.divf %378, %379 : vector<16x1xf32>
    %381 = vector.broadcast %380 : vector<16x1xf32> to vector<16x32xf32>
    %382 = arith.subf %376, %381 : vector<16x32xf32>
    %383 = arith.mulf %382, %382 : vector<16x32xf32>
    %cst_170 = arith.constant dense<0.000000e+00> : vector<16xf32>
    %384 = vector.multi_reduction <add>, %383, %cst_170 [1] : vector<16x32xf32> to vector<16xf32>
    %385 = vector.shape_cast %384 : vector<16xf32> to vector<16x1xf32>
    %cst_171 = arith.constant 3.200000e+01 : f32
    %386 = vector.broadcast %cst_171 : f32 to vector<16x1xf32>
    %387 = arith.divf %385, %386 : vector<16x1xf32>
    %388 = vector.broadcast %380 : vector<16x1xf32> to vector<16x32xf32>
    %389 = arith.subf %376, %388 : vector<16x32xf32>
    %cst_172 = arith.constant 9.99999996E-13 : f32
    %390 = vector.broadcast %cst_172 : f32 to vector<16x1xf32>
    %391 = arith.addf %387, %390 : vector<16x1xf32>
    %392 = math.rsqrt %391 : vector<16x1xf32>
    %393 = vector.broadcast %392 : vector<16x1xf32> to vector<16x32xf32>
    %394 = arith.mulf %389, %393 : vector<16x32xf32>
    %395 = vector.broadcast %256 : vector<1x32xf32> to vector<16x32xf32>
    %396 = arith.mulf %394, %395 : vector<16x32xf32>
    %397 = vector.broadcast %258 : vector<1x32xf32> to vector<16x32xf32>
    %398 = arith.addf %396, %397 : vector<16x32xf32>
    %399 = vector.extract_strided_slice %398 {offsets = [0, 0], sizes = [1, 32], strides = [1, 1]} : vector<16x32xf32> to vector<1x32xf32>
    %400 = vector.extract_strided_slice %398 {offsets = [8, 0], sizes = [1, 32], strides = [1, 1]} : vector<16x32xf32> to vector<1x32xf32>
    %401 = tpu.concatenate %399, %400 in 0 : vector<1x32xf32>, vector<1x32xf32> -> vector<2x32xf32>
    %c0_173 = arith.constant 0 : index
    %c0_174 = arith.constant 0 : index
    %402 = vector.load %arg19[%c0_173, %c0_174] : memref<32x32xf32, #tpu.memory_space<vmem>>, vector<32x32xf32>
    %cst_175 = arith.constant dense<0.000000e+00> : vector<2x32xf32>
    %403 = tpu.matmul %401, %402, %cst_175 {dimension_numbers = #tpu.dot_dimension_numbers<[1], [0], [0], [1], [0, 0, 1, 1], [], []>} : vector<2x32xf32>, vector<32x32xf32>, vector<2x32xf32> -> vector<2x32xf32>
    %c0_176 = arith.constant 0 : index
    %c0_177 = arith.constant 0 : index
    %404 = vector.load %arg20[%c0_176, %c0_177] : memref<1x32xf32, #tpu.memory_space<vmem>>, vector<1x32xf32>
    %405 = vector.broadcast %404 : vector<1x32xf32> to vector<2x32xf32>
    %406 = arith.addf %403, %405 : vector<2x32xf32>
    %407 = math.tanh %406 : vector<2x32xf32>
    %c0_178 = arith.constant 0 : index
    %c0_179 = arith.constant 0 : index
    %408 = vector.load %arg21[%c0_178, %c0_179] : memref<2x32xf32, #tpu.memory_space<vmem>>, vector<2x32xf32>
    tpu.vector_store %arg21[%c0_178, %c0_179], %407 {strides = array<i32>} : memref<2x32xf32, #tpu.memory_space<vmem>>, vector<2x32xf32>,
    return
  }
}

</mosaic_0001>

<bundles_post_ra>
// kernel: finbert_forward.1
= control target key start
LH: loop header
LB: loop body
LE: loop exit
PB: predicated region body
PF: predicated region fallthrough
CT: control target
= control target key end

     0   :  { %s4816_s0 = inlined_call_operand.vmem [shape: s32[16,1], index: 0, kind: input, shape index: {}]   ;;  %s4817_s1 = inlined_call_operand.vmem [shape: s32[1,16], index: 1, kind: input, shape index: {}]   ;;  %s4818_s2 = inlined_call_operand.vmem [shape: f32[64,32], index: 2, kind: input, shape index: {}]   ;;  %s4819_s3 = inlined_call_operand.vmem [shape: f32[16,32], index: 3, kind: input, shape index: {}]   ;;  %s4820_s4 = inlined_call_operand.vmem [shape: f32[2,32], index: 4, kind: input, shape index: {}]   ;;  %s4821_s5 = inlined_call_operand.vmem [shape: f32[1,32], index: 5, kind: input, shape index: {}]   ;;  %s4822_s6 = inlined_call_operand.hbm [shape: f32[1,32], index: 6, kind: input, shape index: {}]   ;;  %s4823_s7 = inlined_call_operand.vmem [shape: f32[2,32,96], index: 7, kind: input, shape index: {}]   ;;  %s4824_s8 = inlined_call_operand.vmem [shape: f32[2,1,96], index: 8, kind: input, shape index: {}]   ;;  %s4825_s9 = inlined_call_operand.vmem [shape: f32[2,32,32], index: 9, kind: input, shape index: {}]   ;;  %s4826_s10 = inlined_call_operand.vmem [shape: f32[2,1,32], index: 10, kind: input, shape index: {}]   ;;  %s4827_s11 = inlined_call_operand.vmem [shape: f32[2,1,32], index: 11, kind: input, shape index: {}]   ;;  %s4828_s12 = inlined_call_operand.vmem [shape: f32[2,1,32], index: 12, kind: input, shape index: {}]   ;;  %s4829_s13 = inlined_call_operand.vmem [shape: f32[2,32,64], index: 13, kind: input, shape index: {}]   ;;  %s4830_s14 = inlined_call_operand.vmem [shape: f32[2,1,64], index: 14, kind: input, shape index: {}]   ;;  %s4831_s15 = inlined_call_operand.vmem [shape: f32[2,64,32], index: 15, kind: input, shape index: {}]   ;;  %s4832_s16 = inlined_call_operand.vmem [shape: f32[2,1,32], index: 16, kind: input, shape index: {}]   ;;  %s4833_s17 = inlined_call_operand.hbm [shape: f32[2,1,32], index: 17, kind: input, shape index: {}]   ;;  %s4834_s18 = inlined_call_operand.hbm [shape: f32[2,1,32], index: 18, kind: input, shape index: {}]   ;;  %s4835_s19 = inlined_call_operand.vmem [shape: f32[32,32], index: 19, kind: input, shape index: {}]   ;;  %s4836_s20 = inlined_call_operand.hbm [shape: f32[1,32], index: 20, kind: input, shape index: {}]   ;;  %s4837_s21 = inlined_call_operand.hbm [shape: f32[2,32], index: 21, kind: output, shape index: {}]  }
   0x1   :  { %4845 = sst [smem:[#allocation15_spill]] %s4816_s0 }
   0x2   :  { %4846 = sst [smem:[#allocation16_spill]] %s4817_s1 }
   0x3   :  { %4847 = sst [smem:[#allocation17_spill]] %s4818_s2 }
   0x4   :  { %4848 = sst [smem:[#allocation18_spill]] %s4819_s3 }
   0x5   :  { %4849 = sst [smem:[#allocation19_spill]] %s4820_s4 }
   0x6   :  { %4850 = sst [smem:[#allocation20_spill]] %s4821_s5 }
   0x7   :  { %4851 = sst [smem:[#allocation21_spill]] %s4837_s21 }
   0x8   :  { %26 = vsyncpa [#allocation3], 0 }
   0x9   :  { %27 = vsyncpa [#allocation6], 0 }
   0xa   :  { %28 = vsyncpa [#allocation9], 0 }
   0xb   :  { %29 = vsyncpa [#allocation4], 0  ;;  %s4091_s2 = smov [#allocation5]   ;;  %s3973_s3 = scalar_lea.hbm %s4833_s17, 32 }
   0xc   :  { %s77_s25 = sshll.u32 %s4091_s2, 4  ;;  %p3974_p0 = scmp.ne.s32.totalorder %s4833_s17, %s3973_s3  ;;  %s78_s25 = int_to_ptr.vmem [resolvable:$true] %s77_s25 }
   0xd   :  { %p3977_p1 = scmp.lt.u32.totalorder %s3973_s3, %s4833_s17 }
   0xf   :  { %p3979_p2 = pnand %p3977_p1, %p3974_p0 }
  0x11   :  { %3982 = shalt.err (!%p3979_p2)
}
  0x12   :  { %s3983_s30 = scalar_lea.vmem %s78_s25, 32  ;;  %p3988_p4 = scmp.lt.s32.totalorder %s78_s25, %s78_s25 }
  0x13   :  { %p3984_p3 = scmp.ne.s32.totalorder %s78_s25, %s3983_s30  ;;  %p3989_p5 = scmp.lt.s32.totalorder %s3983_s30, %s3983_s30 }
  0x15   :  { %p3990_p6 = por %p3989_p5, %p3988_p4 }
  0x17   :  { %p3991_p7 = pnand %p3990_p6, %p3984_p3 }
  0x19   :  { %3994 = shalt.err (!%p3991_p7)
}
  0x1a   :  { %s4841_s5 = smov 16   ;;  %s4093_s22 = smov 1  }
  0x1b   :  { %83 = dma.hbm_to_vmem [thread:$0]  %s4833_s17, 32, %s78_s25, [#allocation6], %s4841_s5, %s4841_s5, %s4093_s22  }
  0x1c   :  { %s4094_s24 = smov [#allocation2]   ;;  %s4095_s26 = smov [#allocation7]  }
  0x1d   :  { %s48_s2 = sshll.u32 %s4094_s24, 4  ;;  %s89_s27 = sshll.u32 %s4095_s26, 4  ;;  %s49_s2 = int_to_ptr.vmem [resolvable:$true] %s48_s2  ;;  %s90_s27 = int_to_ptr.vmem [resolvable:$true] %s89_s27 }
  0x1e   :  { %s3995_s29 = scalar_lea.hbm %s4822_s6, 16 }
  0x1f   :  { %p3996_p8 = scmp.ne.s32.totalorder %s4822_s6, %s3995_s29  ;;  %p3999_p9 = scmp.lt.u32.totalorder %s3995_s29, %s4822_s6 }
  0x21   :  { %p4001_p10 = pnand %p3999_p9, %p3996_p8 }
  0x23   :  { %4004 = shalt.err (!%p4001_p10)
}
  0x24   :  { %s4005_s17 = scalar_lea.vmem %s49_s2, 16  ;;  %s4009_s25 = scalar_lea.vmem %s49_s2, 32 }
  0x25   :  { %p4006_p11 = scmp.ne.s32.totalorder %s49_s2, %s4005_s17  ;;  %p4010_p12 = scmp.lt.s32.totalorder %s49_s2, %s49_s2 }
  0x26   :  { %p4011_p13 = scmp.lt.s32.totalorder %s4009_s25, %s4005_s17 }
  0x28   :  { %p4012_p0 = por %p4011_p13, %p4010_p12 }
  0x2a   :  { %p4013_p1 = pnand %p4012_p0, %p4006_p11 }
  0x2c   :  { %4016 = shalt.err (!%p4013_p1)
}
  0x2d   :  { %51 = dma.hbm_to_vmem [thread:$0]  %s4822_s6, 16, %s49_s2, [#allocation3]  }
  0x2e   :  { %s4017_s21 = scalar_lea.hbm %s4834_s18, 32 }
  0x2f   :  { %p4018_p2 = scmp.ne.s32.totalorder %s4834_s18, %s4017_s21  ;;  %p4021_p3 = scmp.lt.u32.totalorder %s4017_s21, %s4834_s18 }
  0x31   :  { %p4023_p4 = pnand %p4021_p3, %p4018_p2 }
  0x33   :  { %4026 = shalt.err (!%p4023_p4)
}
  0x34   :  { %s4027_s4 = scalar_lea.vmem %s90_s27, 32  ;;  %p4032_p6 = scmp.lt.s32.totalorder %s90_s27, %s90_s27 }
  0x35   :  { %p4028_p5 = scmp.ne.s32.totalorder %s90_s27, %s4027_s4  ;;  %p4033_p7 = scmp.lt.s32.totalorder %s4027_s4, %s4027_s4 }
  0x37   :  { %p4034_p8 = por %p4033_p7, %p4032_p6 }
  0x39   :  { %p4035_p9 = pnand %p4034_p8, %p4028_p5 }
  0x3b   :  { %4038 = shalt.err (!%p4035_p9)
}
  0x3c   :  { %95 = dma.hbm_to_vmem [thread:$0]  %s4834_s18, 32, %s90_s27, [#allocation6], %s4841_s5, %s4841_s5, %s4093_s22  }
  0x3d   :  { %s4096_s30 = smov [#allocation8]   ;;  %s4039_s1 = scalar_lea.hbm %s4836_s20, 16 }
  0x3e   :  { %s104_s17 = sshll.u32 %s4096_s30, 4  ;;  %p4040_p10 = scmp.ne.s32.totalorder %s4836_s20, %s4039_s1  ;;  %s105_s17 = int_to_ptr.vmem [resolvable:$true] %s104_s17 }
  0x3f   :  { %p4043_p11 = scmp.lt.u32.totalorder %s4039_s1, %s4836_s20 }
  0x41   :  { %p4045_p12 = pnand %p4043_p11, %p4040_p10 }
  0x43   :  { %4048 = shalt.err (!%p4045_p12)
}
  0x44   :  { %s4049_s28 = scalar_lea.vmem %s105_s17, 16  ;;  %s4053_s18 = scalar_lea.vmem %s105_s17, 32 }
  0x45   :  { %p4050_p13 = scmp.ne.s32.totalorder %s105_s17, %s4049_s28  ;;  %p4054_p0 = scmp.lt.s32.totalorder %s105_s17, %s105_s17 }
  0x46   :  { %p4055_p1 = scmp.lt.s32.totalorder %s4053_s18, %s4049_s28 }
  0x48   :  { %p4056_p2 = por %p4055_p1, %p4054_p0 }
  0x4a   :  { %p4057_p3 = pnand %p4056_p2, %p4050_p13 }
  0x4c   :  { %4060 = shalt.err (!%p4057_p3)
}
  0x4d   :  { %107 = dma.hbm_to_vmem [thread:$0]  %s4836_s20, 16, %s105_s17, [#allocation9]  }
  0x4e   :  { %4083 = dma.done.wait [#allocation3], 16  }
  0x4f   :  { %4084 = vsyncadd [#allocation3], 4294967280 }
  0x50   :  { %4085 = dma.done.wait [#allocation6], 64  }
  0x51   :  { %4086 = vsyncadd [#allocation6], 4294967232 }
  0x52   :  { %4087 = dma.done.wait [#allocation9], 16  }
  0x53   :  { %4088 = vsyncadd [#allocation9], 4294967280  ;;  %v122_v0 = vlaneseq  ;;  %v4097_v1 = vmov 0   ;;  %s4852_s4 = sld [smem:[#allocation16_spill]]  ;;  %s4853_s30 = sld [smem:[#allocation15_spill]]  ;;  %vm145_vm1 = vcmask 523264  }
  0x54   :  { %3798 = vset.pattern.permute.xlu0 %v4097_v1  ;;  %s4854_s25 = sld [smem:[#allocation17_spill]]  ;;  %v4098_v23 = vmov 0.0   ;;  %s4856_s24 = sld [smem:[#allocation19_spill]]  ;;  %vm236_vm4 = vcmask 261120   ;;  %v319_v47 = vld [vmem:[%s4823_s7] sm:$0xff]  ;;  %v320_v48 = vld [vmem:[%s4823_s7 + $0x8] sm:$0xff] }
  0x55   :  { %v311_v2 = vshrl.u32 %v122_v0, 7  ;;  %v4315_v21 = vand.u32 127, %v122_v0  ;;  %v321_v49 = vld [vmem:[%s4823_s7 + $0x10] sm:$0xff]  ;;  %v3607_v50 = vpack.c.bf16 %v320_v48, %v319_v47  ;;  %v322_v51 = vld [vmem:[%s4823_s7 + $0x18] sm:$0xff]  ;;  %s4857_s6 = sld [smem:[#allocation20_spill]]  ;;  %vm440_vm5 = vcmask 64512  }
  0x56   :  { %v3611_v52 = vpack.c.bf16 %v322_v51, %v321_v49  ;;  %v3101_v62 = vld [vmem:[#allocation2] ss:$0 sm:$0xff]  ;;  %s4099_s20 = smov 96   ;;  %vm4373_vm6 = vmpackc.low %vm440_vm5, %vm440_vm5  ;;  %vm528_vm14 = vcmask 130048   ;;  %s4101_s17 = smov 88   ;;  %vm1278_vm15 = vcmask 195584  }
  0x57   :  { %v312_v3 = vsub.s32 0, %v311_v2  ;;  %3608 = vmatprep.subr.bf16.mxu1 %v3607_v50  ;;  %vm300_vm7 = vcmp.ge.s32.totalorder %v4315_v21, 8  ;;  %vm301_vm8 = vcmp.lt.s32.totalorder %v4315_v21, 16  ;;  %vm290_vm11 = vcmp.lt.s32.totalorder %v4315_v21, 8  ;;  %s4103_s23 = smov 120   ;;  %s4104_s1 = smov 56  }
  0x58   :  { %3610 = vmatpush3.bf16.msra.mxu1 %v3607_v50  ;;  %vm302_vm9 = vmand %vm300_vm7, %vm301_vm8  ;;  %s4106_s26 = smov 80   ;;  %s4107_s21 = smov 48  }
  0x59   :  { %v307_v4 = vld [vmem:[%s4852_s4] sm:$0x1]  ;;  %v121_v10 = vld [vmem:[%s4853_s30 + $0x8] sm:$0xff]  ;;  %3612 = vmatprep.subr.bf16.mxu1 %v3611_v52  ;;  %s4108_s3 = smov 104   ;;  %s4109_s28 = smov 72  }
  0x5a   :  { %v120_v5 = vld [vmem:[%s4853_s30] sm:$0xff]  ;;  %vm308_vm0 = vcmp.gt.s32.totalorder %v307_v4, 0  ;;  %v137_v7 = vld [vmem:[%s4854_s25 + $0x8] sm:$0xff]  ;;  %v138_v8 = vld [vmem:[%s4854_s25 + $0x10] sm:$0xff]  ;;  %s4110_s18 = smov 40   ;;  %s4111_s22 = smov 8  }
  0x5b   :  { %125 = vperm.xlu0 %3798, %v120_v5   ;;  %v136_v6 = vld [vmem:[%s4854_s25] sm:$0xff]  ;;  %v309_v9 = vsel %vm308_vm0, 1, %v4097_v1  ;;  %v139_v12 = vld [vmem:[%s4854_s25 + $0x18] sm:$0xff]  ;;  %v141_v16 = vld [vmem:[%s4854_s25 + $0x28] sm:$0xff]  ;;  %s4843_s27 = smov 24   ;;  %vm4114_vm0 = vmmov 0  }
  0x5c   :  { %v3591_v11 = vpack.c.bf16 %v137_v7, %v136_v6  ;;  %v4301_v13 = vrot.slane %v309_v9, %v312_v3  ;;  %v3595_v14 = vpack.c.bf16 %v139_v12, %v138_v8  ;;  %v140_v15 = vld [vmem:[%s4854_s25 + $0x20] sm:$0xff]  ;;  %v142_v18 = vld [vmem:[%s4854_s25 + $0x30] sm:$0xff]  ;;  %v143_v19 = vld [vmem:[%s4854_s25 + $0x38] sm:$0xff]  ;;  %s4855_s25 = sld [smem:[#allocation18_spill]]  ;;  %3614 = vmatpush3.bf16.msra.mxu1 %v3611_v52 }
  0x5d   :  { %v3599_v17 = vpack.c.bf16 %v141_v16, %v140_v15  ;;  %v3603_v20 = vpack.c.bf16 %v143_v19, %v142_v18  ;;  %v3099_v30 = vld [vmem:[%s4856_s24] ss:$0 sm:$0xff]  ;;  %s4105_s24 = smov 112  }
  0x5e   :  { %3592 = vmatprep.subr.bf16.mxu0 %v3591_v11  ;;  %v3100_v60 = vld [vmem:[%s4857_s6] ss:$0 sm:$0xff]  ;;  %vm314_vm10 = vcmp.eq.s32.totalorder %v4301_v13, 1 }
  0x5f   :  { %128 = vperm.xlu0 %3798, %v121_v10   ;;  %3594 = vmatpush3.bf16.msra.mxu0 %v3591_v11  ;;  %v3102_v5 = vld [vmem:[%s4824_s8] ss:$0 sm:$0xff]  ;;  %vm316_vm12 = vmand %vm302_vm9, %vm314_vm10 }
  0x60   :  { %3596 = vmatprep.subr.bf16.mxu0 %v3595_v14  ;;  %vm315_vm13 = vmand %vm290_vm11, %vm314_vm10 }
  0x62   :  { %v144_v27 = vld [vmem:[%s4855_s25] sm:$0xff]  ;;  %s4102_s25 = smov 64  }
  0x63   :  { %3598 = vmatpush3.bf16.msra.mxu0 %v3595_v14 }
  0x64   :  { %3600 = vmatprep.subr.bf16.mxu0 %v3599_v17 }
  0x67   :  { %3602 = vmatpush3.bf16.msra.mxu0 %v3599_v17  ;;  %v4100_v17 = vmov -1e+09  }
  0x68   :  { %3604 = vmatprep.subr.bf16.mxu0 %v3603_v20  ;;  %v4387_v18 = vsel %vm316_vm12, 0.0, %v4100_v17 }
  0x6b   :  { %3606 = vmatpush3.bf16.msra.mxu0 %v3603_v20  ;;  %v4389_v20 = vsel %vm315_vm13, 0.0, %v4100_v17 }
  0xda   :  { %v126_v22 = vpop.permute.xlu0 %125 }
  0xdb   :  { %vm130_vm2 = vcmp.eq.s32.totalorder %v4315_v21, %v126_v22 }
  0xdc   :  { %v3095_v24 = vsel %vm130_vm2, 1.0, %v4098_v23  ;;  %vm3076_vm2 = vcmask 254976  }
  0xdd   :  { %3361 = vmatprep.mubr.msk.f32.mxu0 %vm145_vm1, %v3095_v24 }
  0xde   :  { %v129_v25 = vpop.permute.xlu0 %128 }
  0xdf   :  { %vm131_vm3 = vcmp.eq.s32.totalorder %v4315_v21, %v129_v25 }
  0xe0   :  { %v3096_v26 = vsel %vm131_vm3, 1.0, %v4098_v23 }
  0xe1   :  { %3362 = vmatmul.mubr.msk.f32.vlgmr.msra.gmra.mrb[0].mxu0 %vm145_vm1, %v3096_v26 }
 0x1b4   :  { %v3363_v28 = vpop.f32.mrb[0].mxu0 }
 0x1b5   :  { %v218_v29 = vpop.f32.mrb[1].mxu0  ;;  %v224_v31 = vadd.f32 %v3363_v28, %v144_v27 }
 0x1b6   :  { %v219_v32 = vadd.f32 %v218_v29, %v144_v27 }
 0x1b7   :  { %v233_v35 = vadd.f32 %v3099_v30, %v224_v31 }
 0x1b8   :  { %v232_v33 = vadd.f32 %v3099_v30, %v219_v32 }
 0x1b9   :  { %v240_v36 = vsel %vm236_vm4, %v233_v35, 0.0 }
 0x1ba   :  { %v237_v34 = vsel %vm236_vm4, %v232_v33, 0.0 }
 0x1bb   :  { %238 = vadd.xlane.f32.xlu1 %v237_v34 }
 0x1bf   :  { %241 = vadd.xlane.f32.xlu1 %v240_v36 }
 0x248   :  { %v239_v37 = vpop.xlane.xlu1 %238 }
 0x249   :  { %v244_v38 = vmul.f32 0.03125, %v239_v37 }
 0x24b   :  { %v246_v39 = vsub.f32 %v232_v33, %v244_v38 }
 0x24c   :  { %v242_v40 = vpop.xlane.xlu1 %241 }
 0x24d   :  { %v245_v41 = vmul.f32 0.03125, %v242_v40  ;;  %v248_v42 = vmul.f32 %v246_v39, %v246_v39 }
 0x24f   :  { %v247_v43 = vsub.f32 %v233_v35, %v245_v41  ;;  %v250_v44 = vsel %vm236_vm4, %v248_v42, 0.0 }
 0x250   :  { %251 = vadd.xlane.f32.xlu0 %v250_v44 }
 0x251   :  { %v249_v45 = vmul.f32 %v247_v43, %v247_v43 }
 0x253   :  { %v253_v46 = vsel %vm236_vm4, %v249_v45, 0.0 }
 0x254   :  { %254 = vadd.xlane.f32.xlu1 %v253_v46 }
 0x2dd   :  { %v252_v53 = vpop.xlane.xlu0 %251 }
 0x2de   :  { %v256_v54 = vmul.f32 0.03125, %v252_v53 }
 0x2e0   :  { %v258_v55 = vadd.f32 1e-12, %v256_v54 }
 0x2e1   :  { %v255_v56 = vpop.xlane.xlu1 %254 }
 0x2e2   :  { %3879 = vrsqrt.f32 %v258_v55  ;;  %v257_v57 = vmul.f32 0.03125, %v255_v56 }
 0x2e4   :  { %v259_v58 = vadd.f32 1e-12, %v257_v57 }
 0x2e6   :  { %3881 = vrsqrt.f32 %v259_v58 }
 0x2ec   :  { %v3880_v59 = vpop.eup %3879 }
 0x2ed   :  { %v262_v61 = vmul.f32 %v3880_v59, %v246_v39 }
 0x2ef   :  { %v270_v63 = vmul.f32 %v3100_v60, %v262_v61 }
 0x2f0   :  { %v3882_v0 = vpop.eup %3881 }
 0x2f1   :  { %v263_v1 = vmul.f32 %v3882_v0, %v247_v43  ;;  %v4348_v2 = vadd.f32 %v3101_v62, %v270_v63 }
 0x2f3   :  { %v271_v3 = vmul.f32 %v3100_v60, %v263_v1  ;;  %3372 = vmatprep.mubr.msk.f32.mxu1 %vm236_vm4, %v4348_v2 }
 0x2f5   :  { %v4352_v4 = vadd.f32 %v3101_v62, %v271_v3 }
 0x2f7   :  { %3373 = vmatmul.mubr.msk.f32.vlgmr.msra.gmra.mrb[0].mxu1 %vm236_vm4, %v4352_v4 }
 0x3ca   :  { %v3374_v6 = vpop.f32.mrb[0].mxu1 }
 0x3cb   :  { %v4359_v7 = vadd.f32 %v3374_v6, %v3102_v5  ;;  %v425_v8 = vpop.f32.mrb[1].mxu1 }
 0x3cc   :  { %v4361_v9 = vadd.f32 %v3102_v5, %v425_v8 }
 0x3ce   :  { %3379 = vmatprep.mubr.msk.f32.mxu1 %vm440_vm5, %v4361_v9  ;;  %v4367_v10 = vpack.i.bf16 %v4359_v7, %v4361_v9 }
 0x3d0   :  { %3800 = vrot.lane.b32.xlu1 %v4367_v10, %s4099_s20 }
 0x442   :  { %v3801_v11 = vpop.permute.xlu1 %3800 }
 0x443   :  { %v3803_v12 = vunpack.i.h.bf16 %v3801_v11  ;;  %v3802_v14 = vunpack.i.l.bf16 %v3801_v11 }
 0x445   :  { %v3615_v16 = vpack.c.bf16 %v3803_v12, %v3802_v14 }
 0x447   :  { %3617 = vmatprep.subr.msk.bf16.mxu1 %vm4373_vm6, %v3615_v16 }
 0x448   :  { %3620 = vmatpush3.bf16.xpose.msk.msra.mxu1 %vm4373_vm6, %v3615_v16 }
 0x44f   :  { %3380 = vmatmul.mubr.msk.f32.vlgmr.msra.gmra.mrb[2].mxu1 %vm440_vm5, %v4359_v7 }
 0x522   :  { %v3381_v19 = vpop.f32.mrb[2].mxu1 }
 0x523   :  { %v525_v22 = vmul.f32 0.35355338, %v3381_v19  ;;  %v515_v24 = vpop.f32.mrb[3].mxu1 }
 0x524   :  { %v524_v25 = vmul.f32 0.35355338, %v515_v24 }
 0x525   :  { %v527_v26 = vadd.f32 %v525_v22, %v4387_v18 }
 0x526   :  { %v526_v27 = vadd.f32 %v524_v25, %v4389_v20 }
 0x527   :  { %v532_v13 = vsel %vm528_vm14, %v527_v26, -inf }
 0x528   :  { %533 = vmax.xlane.f32.xlu0 %v532_v13  ;;  %v529_v21 = vsel %vm528_vm14, %v526_v27, -inf }
 0x529   :  { %530 = vmax.xlane.f32.xlu1 %v529_v21 }
 0x53a   :  { %3810 = vrot.lane.b32.xlu1 %v4367_v10, %s4101_s17 }
 0x53e   :  { %3805 = vrot.lane.b32.xlu0 %v4367_v10, %s4102_s25 }
 0x5b5   :  { %v534_v28 = vpop.xlane.xlu0 %533 }
 0x5b6   :  { %v536_v29 = vsub.f32 %v527_v26, %v534_v28  ;;  %v531_v30 = vpop.xlane.xlu1 %530 }
 0x5b7   :  { %v535_v31 = vsub.f32 %v526_v27, %v531_v30 }
 0x5b8   :  { %v539_v32 = vmul.f32 1.442695, %v536_v29 }
 0x5b9   :  { %v537_v33 = vmul.f32 1.442695, %v535_v31  ;;  %v3806_v34 = vpop.permute.xlu0 %3805 }
 0x5ba   :  { %3883 = vpow2.f32 %v539_v32  ;;  %v3808_v35 = vunpack.i.h.bf16 %v3806_v34  ;;  %v3807_v36 = vunpack.i.l.bf16 %v3806_v34  ;;  %v3811_v37 = vpop.permute.xlu1 %3810 }
 0x5bb   :  { %v3813_v38 = vunpack.i.h.bf16 %v3811_v37  ;;  %v3812_v39 = vunpack.i.l.bf16 %v3811_v37  ;;  %3885 = vpow2.f32 %v537_v33 }
 0x5bc   :  { %v3621_v40 = vpack.c.bf16 %v3808_v35, %v3807_v36 }
 0x5bd   :  { %v3625_v41 = vpack.c.bf16 %v3813_v38, %v3812_v39 }
 0x5be   :  { %3622 = vmatprep.subr.bf16.mxu1 %v3621_v40 }
 0x5bf   :  { %3624 = vmatpush3.bf16.msra.mxu1 %v3621_v40 }
 0x5c0   :  { %3627 = vmatprep.subr.msk.bf16.mxu1 %vm4373_vm6, %v3625_v41 }
 0x5c4   :  { %v3884_v42 = vpop.eup %3883 }
 0x5c5   :  { %v544_v43 = vsel %vm528_vm14, %v3884_v42, 0.0  ;;  %v3886_v44 = vpop.eup %3885 }
 0x5c6   :  { %545 = vadd.xlane.f32.xlu0 %v544_v43  ;;  %v541_v45 = vsel %vm528_vm14, %v3886_v44, 0.0 }
 0x5ca   :  { %542 = vadd.xlane.f32.xlu0 %v541_v45 }
 0x5e0   :  { %638 = vrot.lane.b32.xlu0 %v4361_v9, %s4103_s23 }
 0x5e4   :  { %640 = vrot.lane.b32.xlu0 %v4359_v7, %s4103_s23 }
 0x653   :  { %v546_v46 = vpop.xlane.xlu0 %545 }
 0x654   :  { %3887 = vrcp.f32 %v546_v46 }
 0x657   :  { %v543_v47 = vpop.xlane.xlu0 %542 }
 0x658   :  { %3889 = vrcp.f32 %v543_v47 }
 0x65b   :  { %v639_v52 = vpop.permute.xlu0 %638 }
 0x65e   :  { %v3888_v48 = vpop.eup %3887 }
 0x65f   :  { %v550_v51 = vmul.f32 %v3888_v48, %v3884_v42  ;;  %v641_v53 = vpop.permute.xlu0 %640 }
 0x662   :  { %v3890_v49 = vpop.eup %3889 }
 0x663   :  { %v548_v50 = vmul.f32 %v3890_v49, %v3886_v44 }
 0x665   :  { %3386 = vmatprep.mubr.msk.f32.mxu1 %vm528_vm14, %v548_v50 }
 0x666   :  { %3387 = vmatmul.mubr.msk.f32.vlgmr.msra.gmra.mrb[4].mxu1 %vm528_vm14, %v550_v51 }
 0x667   :  { %3630 = vmatpush3.bf16.xpose.msk.msra.mxu1 %vm4373_vm6, %v3625_v41  ;;  %3393 = vmatprep.mubr.msk.f32.mxu1 %vm440_vm5, %v639_v52 }
 0x66e   :  { %3394 = vmatmul.mubr.msk.f32.vlgmr.msra.gmra.mrb[6].mxu1 %vm440_vm5, %v641_v53 }
 0x739   :  { %v4413_v54 = vpop.f32.mrb[4].mxu1 }
 0x73a   :  { %v4415_v55 = vpop.f32.mrb[5].mxu1 }
 0x741   :  { %v3395_v56 = vpop.f32.mrb[6].mxu1 }
 0x742   :  { %v730_v57 = vmul.f32 0.35355338, %v3395_v56  ;;  %v720_v58 = vpop.f32.mrb[7].mxu1 }
 0x743   :  { %v729_v59 = vmul.f32 0.35355338, %v720_v58 }
 0x744   :  { %v732_v60 = vadd.f32 %v730_v57, %v4387_v18 }
 0x745   :  { %v731_v61 = vadd.f32 %v729_v59, %v4389_v20 }
 0x746   :  { %v736_v62 = vsel %vm528_vm14, %v732_v60, -inf }
 0x747   :  { %737 = vmax.xlane.f32.xlu1 %v736_v62  ;;  %v733_v63 = vsel %vm528_vm14, %v731_v61, -inf }
 0x748   :  { %734 = vmax.xlane.f32.xlu0 %v733_v63 }
 0x758   :  { %3815 = vrot.lane.b32.xlu1 %v4367_v10, %s4104_s1 }
 0x75c   :  { %842 = vrot.lane.b32.xlu1 %v4361_v9, %s4105_s24 }
 0x760   :  { %844 = vrot.lane.b32.xlu1 %v4359_v7, %s4105_s24 }
 0x7d4   :  { %v738_v0 = vpop.xlane.xlu1 %737 }
 0x7d5   :  { %v740_v1 = vsub.f32 %v732_v60, %v738_v0  ;;  %v735_v3 = vpop.xlane.xlu0 %734 }
 0x7d6   :  { %v739_v5 = vsub.f32 %v731_v61, %v735_v3 }
 0x7d7   :  { %v743_v6 = vmul.f32 1.442695, %v740_v1 }
 0x7d8   :  { %v741_v8 = vmul.f32 1.442695, %v739_v5  ;;  %v3816_v11 = vpop.permute.xlu1 %3815 }
 0x7d9   :  { %3891 = vpow2.f32 %v743_v6  ;;  %v3818_v12 = vunpack.i.h.bf16 %v3816_v11  ;;  %v3817_v14 = vunpack.i.l.bf16 %v3816_v11 }
 0x7da   :  { %3893 = vpow2.f32 %v741_v8 }
 0x7db   :  { %v3631_v16 = vpack.c.bf16 %v3818_v12, %v3817_v14 }
 0x7dc   :  { %v843_v33 = vpop.permute.xlu1 %842 }
 0x7dd   :  { %3632 = vmatprep.subr.bf16.mxu0 %v3631_v16 }
 0x7de   :  { %3634 = vmatpush3.bf16.msra.mxu0 %v3631_v16 }
 0x7e0   :  { %v845_v34 = vpop.permute.xlu1 %844 }
 0x7e3   :  { %v3892_v17 = vpop.eup %3891 }
 0x7e4   :  { %v748_v19 = vsel %vm528_vm14, %v3892_v17, 0.0  ;;  %v3894_v22 = vpop.eup %3893 }
 0x7e5   :  { %749 = vadd.xlane.f32.xlu0 %v748_v19  ;;  %v745_v24 = vsel %vm528_vm14, %v3894_v22, 0.0 }
 0x7e9   :  { %746 = vadd.xlane.f32.xlu0 %v745_v24 }
 0x7ff   :  { %3820 = vrot.lane.b32.xlu0 %v4367_v10, %s4106_s26 }
 0x872   :  { %v750_v25 = vpop.xlane.xlu0 %749 }
 0x873   :  { %3895 = vrcp.f32 %v750_v25 }
 0x876   :  { %v747_v26 = vpop.xlane.xlu0 %746 }
 0x877   :  { %3897 = vrcp.f32 %v747_v26 }
 0x87a   :  { %v3821_v27 = vpop.permute.xlu0 %3820 }
 0x87b   :  { %v3823_v13 = vunpack.i.h.bf16 %v3821_v27  ;;  %v3822_v21 = vunpack.i.l.bf16 %v3821_v27 }
 0x87d   :  { %v3635_v28 = vpack.c.bf16 %v3823_v13, %v3822_v21  ;;  %v3896_v29 = vpop.eup %3895 }
 0x87e   :  { %v754_v32 = vmul.f32 %v3896_v29, %v3892_v17 }
 0x87f   :  { %3637 = vmatprep.subr.msk.bf16.mxu0 %vm4373_vm6, %v3635_v28 }
 0x881   :  { %v3898_v30 = vpop.eup %3897 }
 0x882   :  { %v752_v31 = vmul.f32 %v3898_v30, %v3894_v22 }
 0x884   :  { %3400 = vmatprep.mubr.msk.f32.mxu0 %vm528_vm14, %v752_v31 }
 0x885   :  { %3401 = vmatmul.mubr.msk.f32.vlgmr.msra.gmra.mrb[2].mxu0 %vm528_vm14, %v754_v32 }
 0x886   :  { %3640 = vmatpush3.bf16.xpose.msk.msra.mxu0 %vm4373_vm6, %v3635_v28  ;;  %3407 = vmatprep.mubr.msk.f32.mxu0 %vm440_vm5, %v843_v33 }
 0x88d   :  { %3408 = vmatmul.mubr.msk.f32.vlgmr.msra.gmra.mrb[4].mxu0 %vm440_vm5, %v845_v34 }
 0x958   :  { %v4439_v35 = vpop.f32.mrb[2].mxu0 }
 0x959   :  { %v4441_v36 = vpop.f32.mrb[3].mxu0 }
 0x960   :  { %v3409_v37 = vpop.f32.mrb[4].mxu0 }
 0x961   :  { %v934_v38 = vmul.f32 0.35355338, %v3409_v37  ;;  %v924_v39 = vpop.f32.mrb[5].mxu0 }
 0x962   :  { %v933_v40 = vmul.f32 0.35355338, %v924_v39 }
 0x963   :  { %v936_v41 = vadd.f32 %v934_v38, %v4387_v18 }
 0x964   :  { %v935_v42 = vadd.f32 %v933_v40, %v4389_v20 }
 0x965   :  { %v940_v43 = vsel %vm528_vm14, %v936_v41, -inf }
 0x966   :  { %941 = vmax.xlane.f32.xlu1 %v940_v43  ;;  %v937_v44 = vsel %vm528_vm14, %v935_v42, -inf }
 0x967   :  { %938 = vmax.xlane.f32.xlu0 %v937_v44 }
 0x977   :  { %3825 = vrot.lane.b32.xlu1 %v4367_v10, %s4107_s21 }
 0x97b   :  { %1046 = vrot.lane.b32.xlu1 %v4361_v9, %s4108_s3 }
 0x97f   :  { %1048 = vrot.lane.b32.xlu1 %v4359_v7, %s4108_s3 }
 0x9f3   :  { %v942_v45 = vpop.xlane.xlu1 %941 }
 0x9f4   :  { %v944_v46 = vsub.f32 %v936_v41, %v942_v45  ;;  %v939_v47 = vpop.xlane.xlu0 %938 }
 0x9f5   :  { %v943_v48 = vsub.f32 %v935_v42, %v939_v47  ;;  %v326_v47 = vld [vmem:[%s4825_s9 + $0x10] sm:$0xff] }
 0x9f6   :  { %v947_v49 = vmul.f32 1.442695, %v944_v46  ;;  %v324_v46 = vld [vmem:[%s4825_s9] sm:$0xff] }
 0x9f7   :  { %v945_v50 = vmul.f32 1.442695, %v943_v48  ;;  %v3826_v51 = vpop.permute.xlu1 %3825 }
 0x9f8   :  { %3899 = vpow2.f32 %v947_v49  ;;  %v3828_v52 = vunpack.i.h.bf16 %v3826_v51  ;;  %v3827_v53 = vunpack.i.l.bf16 %v3826_v51  ;;  %v327_v49 = vld [vmem:[%s4825_s9 + $0x18] sm:$0xff] }
 0x9f9   :  { %3901 = vpow2.f32 %v945_v50  ;;  %v3659_v50 = vpack.c.bf16 %v327_v49, %v326_v47  ;;  %v337_v47 = vld [vmem:[%s4831_s15 + $0x8] sm:$0xff]  ;;  %v338_v49 = vld [vmem:[%s4831_s15 + $0x10] sm:$0xff] }
 0x9fa   :  { %v3641_v56 = vpack.c.bf16 %v3828_v52, %v3827_v53 }
 0x9fb   :  { %v1047_v8 = vpop.permute.xlu1 %1046 }
 0x9fc   :  { %3642 = vmatprep.subr.bf16.mxu1 %v3641_v56 }
 0x9fd   :  { %3644 = vmatpush3.bf16.msra.mxu1 %v3641_v56 }
 0x9ff   :  { %v1049_v11 = vpop.permute.xlu1 %1048 }
 0xa02   :  { %v3900_v57 = vpop.eup %3899 }
 0xa03   :  { %v952_v9 = vsel %vm528_vm14, %v3900_v57, 0.0  ;;  %v3902_v58 = vpop.eup %3901 }
 0xa04   :  { %953 = vadd.xlane.f32.xlu0 %v952_v9  ;;  %v949_v7 = vsel %vm528_vm14, %v3902_v58, 0.0 }
 0xa08   :  { %950 = vadd.xlane.f32.xlu0 %v949_v7 }
 0xa1e   :  { %3830 = vrot.lane.b32.xlu0 %v4367_v10, %s4109_s28 }
 0xa91   :  { %v954_v59 = vpop.xlane.xlu0 %953 }
 0xa92   :  { %3903 = vrcp.f32 %v954_v59 }
 0xa95   :  { %v951_v60 = vpop.xlane.xlu0 %950 }
 0xa96   :  { %3905 = vrcp.f32 %v951_v60 }
 0xa99   :  { %v3831_v61 = vpop.permute.xlu0 %3830 }
 0xa9a   :  { %v3833_v62 = vunpack.i.h.bf16 %v3831_v61  ;;  %v3832_v63 = vunpack.i.l.bf16 %v3831_v61 }
 0xa9c   :  { %v3645_v0 = vpack.c.bf16 %v3833_v62, %v3832_v63  ;;  %v3904_v1 = vpop.eup %3903 }
 0xa9d   :  { %v958_v6 = vmul.f32 %v3904_v1, %v3900_v57 }
 0xa9e   :  { %3647 = vmatprep.subr.msk.bf16.mxu1 %vm4373_vm6, %v3645_v0 }
 0xaa0   :  { %v3906_v3 = vpop.eup %3905 }
 0xaa1   :  { %v956_v5 = vmul.f32 %v3906_v3, %v3902_v58 }
 0xaa3   :  { %3414 = vmatprep.mubr.msk.f32.mxu1 %vm528_vm14, %v956_v5 }
 0xaa4   :  { %3415 = vmatmul.mubr.msk.f32.vlgmr.msra.gmra.mrb[8].mxu1 %vm528_vm14, %v958_v6 }
 0xaa5   :  { %3650 = vmatpush3.bf16.xpose.msk.msra.mxu1 %vm4373_vm6, %v3645_v0  ;;  %3421 = vmatprep.mubr.msk.f32.mxu1 %vm440_vm5, %v1047_v8 }
 0xaac   :  { %3422 = vmatmul.mubr.msk.f32.vlgmr.msra.gmra.mrb[10].mxu1 %vm440_vm5, %v1049_v11 }
 0xb77   :  { %v3416_v12 = vpop.f32.mrb[8].mxu1 }
 0xb78   :  { %v1037_v14 = vpop.f32.mrb[9].mxu1 }
 0xb7f   :  { %v3423_v16 = vpop.f32.mrb[10].mxu1 }
 0xb80   :  { %v1138_v17 = vmul.f32 0.35355338, %v3423_v16  ;;  %v1128_v19 = vpop.f32.mrb[11].mxu1 }
 0xb81   :  { %v1137_v22 = vmul.f32 0.35355338, %v1128_v19 }
 0xb82   :  { %v1140_v24 = vadd.f32 %v1138_v17, %v4387_v18 }
 0xb83   :  { %v1139_v25 = vadd.f32 %v1137_v22, %v4389_v20 }
 0xb84   :  { %v1144_v26 = vsel %vm528_vm14, %v1140_v24, -inf }
 0xb85   :  { %1145 = vmax.xlane.f32.xlu1 %v1144_v26  ;;  %v1141_v27 = vsel %vm528_vm14, %v1139_v25, -inf }
 0xb86   :  { %1142 = vmax.xlane.f32.xlu0 %v1141_v27 }
 0xb96   :  { %3835 = vrot.lane.b32.xlu1 %v4367_v10, %s4110_s18 }
 0xb9a   :  { %1254 = vrot.lane.b32.xlu1 %v4439_v35, %s4111_s22 }
 0xb9e   :  { %1260 = vrot.lane.b32.xlu1 %v1037_v14, %s4841_s5 }
 0xc12   :  { %v1146_v13 = vpop.xlane.xlu1 %1145 }
 0xc13   :  { %v1148_v21 = vsub.f32 %v1140_v24, %v1146_v13  ;;  %v1143_v28 = vpop.xlane.xlu0 %1142  ;;  %v332_v13 = vld [vmem:[%s4829_s13 + $0x8] sm:$0xff] }
 0xc14   :  { %v1147_v29 = vsub.f32 %v1139_v25, %v1143_v28  ;;  %v333_v28 = vld [vmem:[%s4829_s13 + $0x10] sm:$0xff] }
 0xc15   :  { %v1151_v30 = vmul.f32 1.442695, %v1148_v21 }
 0xc16   :  { %v1149_v31 = vmul.f32 1.442695, %v1147_v29  ;;  %v3836_v32 = vpop.permute.xlu1 %3835  ;;  %v334_v29 = vld [vmem:[%s4829_s13 + $0x18] sm:$0xff] }
 0xc17   :  { %v3838_v33 = vunpack.i.h.bf16 %v3836_v32  ;;  %v3837_v34 = vunpack.i.l.bf16 %v3836_v32 }
 0xc18   :  { %3907 = vpow2.f32 %v1149_v31 }
 0xc19   :  { %v3651_v37 = vpack.c.bf16 %v3838_v33, %v3837_v34  ;;  %3909 = vpow2.f32 %v1151_v30  ;;  %v3667_v30 = vpack.c.bf16 %v334_v29, %v333_v28 }
 0xc1a   :  { %v1255_v56 = vpop.permute.xlu1 %1254 }
 0xc1b   :  { %3652 = vmatprep.subr.bf16.mxu0 %v3651_v37  ;;  %v1275_v59 = vsel %vm440_vm5, %v4413_v54, %v1255_v56 }
 0xc1c   :  { %3654 = vmatpush3.bf16.msra.mxu0 %v3651_v37 }
 0xc1e   :  { %v1261_v9 = vpop.permute.xlu1 %1260 }
 0xc22   :  { %v3908_v10 = vpop.eup %3907 }
 0xc23   :  { %v1153_v38 = vsel %vm528_vm14, %v3908_v10, 0.0  ;;  %v3910_v35 = vpop.eup %3909 }
 0xc24   :  { %1154 = vadd.xlane.f32.xlu0 %v1153_v38  ;;  %v1156_v39 = vsel %vm528_vm14, %v3910_v35, 0.0 }
 0xc28   :  { %1157 = vadd.xlane.f32.xlu0 %v1156_v39 }
 0xc3e   :  { %1252 = vrot.lane.b32.xlu0 %v4441_v36, %s4111_s22  ;;  %v325_v36 = vld [vmem:[%s4825_s9 + $0x8] sm:$0xff] }
 0xc3f   :  { %v3655_v48 = vpack.c.bf16 %v325_v36, %v324_v46  ;;  %v336_v36 = vld [vmem:[%s4831_s15] sm:$0xff] }
 0xc41   :  { %3656 = vmatprep.subr.bf16.mxu0 %v3655_v48 }
 0xc42   :  { %1262 = vrot.lane.b32.xlu0 %v3416_v12, %s4841_s5 }
 0xcb1   :  { %v1155_v40 = vpop.xlane.xlu0 %1154 }
 0xcb2   :  { %3911 = vrcp.f32 %v1155_v40 }
 0xcb5   :  { %v1158_v41 = vpop.xlane.xlu0 %1157 }
 0xcb6   :  { %3913 = vrcp.f32 %v1158_v41 }
 0xcb9   :  { %v1253_v53 = vpop.permute.xlu0 %1252 }
 0xcba   :  { %v1274_v58 = vsel %vm440_vm5, %v4415_v55, %v1253_v53  ;;  %v3129_v55 = vld [vmem:[%s4826_s10] ss:$0 sm:$0xff]  ;;  %v341_v53 = vld [vmem:[%s4831_s15 + $0x28] sm:$0xff] }
 0xcbb   :  { %v1276_v61 = vsel %vm528_vm14, %v1274_v58, %v1261_v9  ;;  %v343_v9 = vld [vmem:[%s4831_s15 + $0x38] sm:$0xff] }
 0xcbc   :  { %v3912_v42 = vpop.eup %3911 }
 0xcbd   :  { %v1160_v43 = vmul.f32 %v3912_v42, %v3908_v10  ;;  %v1263_v57 = vpop.permute.xlu0 %1262  ;;  %v3133_v42 = vld [vmem:[%s4828_s12] ss:$0 sm:$0xff] }
 0xcbe   :  { %v1277_v62 = vsel %vm528_vm14, %v1275_v59, %v1263_v57  ;;  %v342_v57 = vld [vmem:[%s4831_s15 + $0x30] sm:$0xff] }
 0xcbf   :  { %3428 = vmatprep.mubr.msk.f32.mxu0 %vm528_vm14, %v1160_v43  ;;  %v3683_v58 = vpack.c.bf16 %v343_v9, %v342_v57 }
 0xcc0   :  { %v3914_v44 = vpop.eup %3913 }
 0xcc1   :  { %v1162_v45 = vmul.f32 %v3914_v44, %v3910_v35  ;;  %v3132_v35 = vld [vmem:[%s4827_s11] ss:$0 sm:$0xff] }
 0xcc3   :  { %3429 = vmatmul.mubr.msk.f32.vlgmr.msra.gmra.mrb[6].mxu0 %vm528_vm14, %v1162_v45 }
 0xcc4   :  { %3658 = vmatpush3.bf16.msra.mxu0 %v3655_v48  ;;  %v3671_v48 = vpack.c.bf16 %v337_v47, %v336_v36 }
 0xcc5   :  { %3660 = vmatprep.subr.bf16.mxu0 %v3659_v50 }
 0xcc8   :  { %3662 = vmatpush3.bf16.msra.mxu0 %v3659_v50  ;;  %v339_v50 = vld [vmem:[%s4831_s15 + $0x18] sm:$0xff] }
 0xcc9   :  { %3672 = vmatprep.subr.bf16.mxu0 %v3671_v48 }
 0xd96   :  { %v3430_v51 = vpop.f32.mrb[6].mxu0 }
 0xd97   :  { %1270 = vrot.lane.b32.xlu0 %v3430_v51, %s4843_s27  ;;  %v1241_v52 = vpop.f32.mrb[7].mxu0  ;;  %v3675_v51 = vpack.c.bf16 %v339_v50, %v338_v49 }
 0xd98   :  { %1268 = vrot.lane.b32.xlu1 %v1241_v52, %s4843_s27  ;;  %v340_v52 = vld [vmem:[%s4831_s15 + $0x20] sm:$0xff] }
 0xd99   :  { %v3679_v56 = vpack.c.bf16 %v341_v53, %v340_v52  ;;  %v3140_v53 = vld [vmem:[#allocation5] ss:$0 sm:$0xff] }
 0xe09   :  { %v1271_v7 = vpop.permute.xlu0 %1270 }
 0xe0a   :  { %v1269_v60 = vpop.permute.xlu1 %1268  ;;  %v1280_v0 = vsel %vm1278_vm15, %v1277_v62, %v1271_v7  ;;  %v3134_v7 = vld [vmem:[%s4830_s14] ss:$0 sm:$0xff] }
 0xe0b   :  { %v1279_v63 = vsel %vm1278_vm15, %v1276_v61, %v1269_v60 }
 0xe0c   :  { %3439 = vmatprep.mubr.msk.f32.mxu0 %vm236_vm4, %v1279_v63 }
 0xe0d   :  { %3440 = vmatmul.mubr.msk.f32.vlgmr.msra.gmra.mrb[8].mxu0 %vm236_vm4, %v1280_v0 }
 0xe0e   :  { %3674 = vmatpush3.bf16.msra.mxu0 %v3671_v48 }
 0xe0f   :  { %3676 = vmatprep.subr.bf16.mxu0 %v3675_v51 }
 0xe12   :  { %3678 = vmatpush3.bf16.msra.mxu0 %v3675_v51 }
 0xe13   :  { %3680 = vmatprep.subr.bf16.mxu0 %v3679_v56 }
 0xe16   :  { %3682 = vmatpush3.bf16.msra.mxu0 %v3679_v56 }
 0xe17   :  { %3684 = vmatprep.subr.bf16.mxu0 %v3683_v58 }
 0xe1a   :  { %3686 = vmatpush3.bf16.msra.mxu0 %v3683_v58  ;;  %v3141_v58 = vld [vmem:[#allocation7] ss:$0 sm:$0xff] }
 0xee0   :  { %v3441_v1 = vpop.f32.mrb[8].mxu0 }
 0xee1   :  { %v1365_v3 = vadd.f32 %v3441_v1, %v3129_v55  ;;  %v1359_v54 = vpop.f32.mrb[9].mxu0 }
 0xee2   :  { %v1360_v5 = vadd.f32 %v3129_v55, %v1359_v54 }
 0xee3   :  { %v1369_v6 = vadd.f32 %v1365_v3, %v4352_v4 }
 0xee4   :  { %v1368_v8 = vadd.f32 %v1360_v5, %v4348_v2  ;;  %v331_v2 = vld [vmem:[%s4829_s13] sm:$0xff] }
 0xee5   :  { %v1373_v11 = vsel %vm236_vm4, %v1369_v6, 0.0  ;;  %v3663_v21 = vpack.c.bf16 %v332_v13, %v331_v2 }
 0xee6   :  { %1374 = vadd.xlane.f32.xlu0 %v1373_v11  ;;  %v1370_v12 = vsel %vm236_vm4, %v1368_v8, 0.0 }
 0xee7   :  { %1371 = vadd.xlane.f32.xlu1 %v1370_v12  ;;  %3664 = vmatprep.subr.bf16.mxu1 %v3663_v21 }
 0xee8   :  { %3666 = vmatpush3.bf16.msra.mxu1 %v3663_v21 }
 0xee9   :  { %3668 = vmatprep.subr.bf16.mxu1 %v3667_v30 }
 0xeec   :  { %3670 = vmatpush3.bf16.msra.mxu1 %v3667_v30 }
 0xf73   :  { %v1375_v14 = vpop.xlane.xlu0 %1374 }
 0xf74   :  { %v1377_v16 = vmul.f32 0.03125, %v1375_v14  ;;  %v1372_v17 = vpop.xlane.xlu1 %1371 }
 0xf75   :  { %v1376_v19 = vmul.f32 0.03125, %v1372_v17 }
 0xf76   :  { %v1379_v22 = vsub.f32 %v1369_v6, %v1377_v16 }
 0xf77   :  { %v1378_v24 = vsub.f32 %v1368_v8, %v1376_v19 }
 0xf78   :  { %v1381_v25 = vmul.f32 %v1379_v22, %v1379_v22 }
 0xf79   :  { %v1380_v26 = vmul.f32 %v1378_v24, %v1378_v24 }
 0xf7a   :  { %v1385_v27 = vsel %vm236_vm4, %v1381_v25, 0.0 }
 0xf7b   :  { %1386 = vadd.xlane.f32.xlu1 %v1385_v27  ;;  %v1382_v4 = vsel %vm236_vm4, %v1380_v26, 0.0  ;;  %v3137_v26 = vld [vmem:[%s4832_s16] ss:$0 sm:$0xff] }
 0xf7c   :  { %1383 = vadd.xlane.f32.xlu0 %v1382_v4 }
0x1008   :  { %v1387_v31 = vpop.xlane.xlu1 %1386 }
0x1009   :  { %v1389_v32 = vmul.f32 0.03125, %v1387_v31  ;;  %v1384_v33 = vpop.xlane.xlu0 %1383 }
0x100a   :  { %v1388_v34 = vmul.f32 0.03125, %v1384_v33 }
0x100b   :  { %v1391_v37 = vadd.f32 1e-12, %v1389_v32 }
0x100c   :  { %v1390_v10 = vadd.f32 1e-12, %v1388_v34 }
0x100d   :  { %3915 = vrsqrt.f32 %v1391_v37 }
0x100e   :  { %3917 = vrsqrt.f32 %v1390_v10 }
0x1017   :  { %v3916_v38 = vpop.eup %3915 }
0x1018   :  { %v3918_v39 = vpop.eup %3917  ;;  %v1395_v40 = vmul.f32 %v3916_v38, %v1379_v22 }
0x1019   :  { %v1394_v41 = vmul.f32 %v3918_v39, %v1378_v24 }
0x101a   :  { %v1403_v43 = vmul.f32 %v3132_v35, %v1395_v40 }
0x101b   :  { %v1402_v44 = vmul.f32 %v3132_v35, %v1394_v41  ;;  %v3142_v41 = vld [vmem:[%s4823_s7 + $0x20] sm:$0xff] }
0x101c   :  { %v1411_v46 = vadd.f32 %v3133_v42, %v1403_v43 }
0x101d   :  { %v1410_v45 = vadd.f32 %v3133_v42, %v1402_v44  ;;  %v3143_v42 = vld [vmem:[%s4823_s7 + $0x28] sm:$0xff]  ;;  %v3144_v44 = vld [vmem:[%s4823_s7 + $0x30] sm:$0xff] }
0x101e   :  { %v3687_v43 = vpack.c.bf16 %v3143_v42, %v3142_v41 }
0x101f   :  { %3450 = vmatprep.mubr.msk.f32.mxu1 %vm236_vm4, %v1410_v45 }
0x1020   :  { %3451 = vmatmul.mubr.msk.f32.vlgmr.msra.gmra.mrb[12].mxu1 %vm236_vm4, %v1411_v46  ;;  %3688 = vmatprep.subr.bf16.mxu1 %v3687_v43 }
0x1021   :  { %3690 = vmatpush3.bf16.msra.mxu1 %v3687_v43 }
0x10f3   :  { %v3452_v59 = vpop.f32.mrb[12].mxu1 }
0x10f4   :  { %v1496_v60 = vadd.f32 %v3452_v59, %v3134_v7  ;;  %v1490_v61 = vpop.f32.mrb[13].mxu1 }
0x10f5   :  { %v1491_v62 = vadd.f32 %v3134_v7, %v1490_v61 }
0x10f6   :  { %v1500_v63 = vmul.f32 %v1496_v60, %v1496_v60 }
0x10f7   :  { %v1499_v0 = vmul.f32 %v1491_v62, %v1491_v62 }
0x10f8   :  { %v1502_v55 = vmul.f32 %v1500_v63, %v1496_v60 }
0x10f9   :  { %v1501_v1 = vmul.f32 %v1499_v0, %v1491_v62 }
0x10fa   :  { %v1504_v3 = vmul.f32 0.044715, %v1502_v55 }
0x10fb   :  { %v1503_v54 = vmul.f32 0.044715, %v1501_v1 }
0x10fc   :  { %v1506_v5 = vadd.f32 %v1504_v3, %v1496_v60 }
0x10fd   :  { %v1505_v6 = vadd.f32 %v1503_v54, %v1491_v62 }
0x10fe   :  { %v1508_v8 = vmul.f32 0.7978846, %v1506_v5 }
0x10ff   :  { %v1507_v11 = vmul.f32 0.7978846, %v1505_v6 }
0x1100   :  { %3919 = vtanh.f32 %v1508_v8 }
0x1101   :  { %3921 = vtanh.f32 %v1507_v11 }
0x110a   :  { %v3920_v12 = vpop.eup %3919 }
0x110b   :  { %v3922_v14 = vpop.eup %3921  ;;  %v1512_v16 = vadd.f32 1.0, %v3920_v12 }
0x110c   :  { %v1511_v17 = vadd.f32 1.0, %v3922_v14 }
0x110d   :  { %v1514_v19 = vmul.f32 0.5, %v1512_v16 }
0x110e   :  { %v1513_v22 = vmul.f32 0.5, %v1511_v17 }
0x110f   :  { %v1516_v25 = vmul.f32 %v1514_v19, %v1496_v60 }
0x1110   :  { %v1515_v24 = vmul.f32 %v1513_v22, %v1491_v62  ;;  %v3168_v62 = vld [vmem:[%s4824_s8 + $0x1] ss:$0 sm:$0xff]  ;;  %s4860_s8 = smov 16  }
0x1112   :  { %3469 = vmatprep.mubr.msk.f32.mxu0 %vm145_vm1, %v1515_v24 }
0x1113   :  { %3470 = vmatmul.mubr.msk.f32.vlgmr.msra.gmra.mrb[10].mxu0 %vm145_vm1, %v1516_v25 }
0x11e6   :  { %v3471_v27 = vpop.f32.mrb[10].mxu0 }
0x11e7   :  { %v1601_v4 = vadd.f32 %v3471_v27, %v3137_v26  ;;  %v1595_v2 = vpop.f32.mrb[11].mxu0 }
0x11e8   :  { %v1596_v13 = vadd.f32 %v3137_v26, %v1595_v2 }
0x11e9   :  { %v1605_v21 = vadd.f32 %v1601_v4, %v1411_v46 }
0x11ea   :  { %v1604_v28 = vadd.f32 %v1596_v13, %v1410_v45  ;;  %v3145_v45 = vld [vmem:[%s4823_s7 + $0x38] sm:$0xff] }
0x11eb   :  { %v1609_v29 = vsel %vm236_vm4, %v1605_v21, 0.0  ;;  %v3691_v46 = vpack.c.bf16 %v3145_v45, %v3144_v44 }
0x11ec   :  { %1610 = vadd.xlane.f32.xlu1 %v1609_v29  ;;  %v1606_v30 = vsel %vm236_vm4, %v1604_v28, 0.0 }
0x11ed   :  { %1607 = vadd.xlane.f32.xlu0 %v1606_v30  ;;  %3692 = vmatprep.subr.bf16.mxu1 %v3691_v46 }
0x11ee   :  { %3694 = vmatpush3.bf16.msra.mxu1 %v3691_v46 }
0x1279   :  { %v1611_v31 = vpop.xlane.xlu1 %1610 }
0x127a   :  { %v1613_v32 = vmul.f32 0.03125, %v1611_v31  ;;  %v1608_v33 = vpop.xlane.xlu0 %1607 }
0x127b   :  { %v1612_v34 = vmul.f32 0.03125, %v1608_v33 }
0x127c   :  { %v1615_v37 = vsub.f32 %v1605_v21, %v1613_v32 }
0x127d   :  { %v1614_v10 = vsub.f32 %v1604_v28, %v1612_v34 }
0x127e   :  { %v1617_v38 = vmul.f32 %v1615_v37, %v1615_v37 }
0x127f   :  { %v1616_v35 = vmul.f32 %v1614_v10, %v1614_v10 }
0x1280   :  { %v1621_v39 = vsel %vm236_vm4, %v1617_v38, 0.0 }
0x1281   :  { %1622 = vadd.xlane.f32.xlu1 %v1621_v39  ;;  %v1618_v40 = vsel %vm236_vm4, %v1616_v35, 0.0 }
0x1282   :  { %1619 = vadd.xlane.f32.xlu0 %v1618_v40 }
0x130e   :  { %v1623_v36 = vpop.xlane.xlu1 %1622 }
0x130f   :  { %v1625_v47 = vmul.f32 0.03125, %v1623_v36  ;;  %v1620_v48 = vpop.xlane.xlu0 %1619 }
0x1310   :  { %v1624_v49 = vmul.f32 0.03125, %v1620_v48 }
0x1311   :  { %v1627_v50 = vadd.f32 1e-12, %v1625_v47 }
0x1312   :  { %v1626_v51 = vadd.f32 1e-12, %v1624_v49 }
0x1313   :  { %3923 = vrsqrt.f32 %v1627_v50 }
0x1314   :  { %3925 = vrsqrt.f32 %v1626_v51 }
0x131d   :  { %v3924_v52 = vpop.eup %3923 }
0x131e   :  { %v3926_v56 = vpop.eup %3925  ;;  %v1631_v57 = vmul.f32 %v3924_v52, %v1615_v37 }
0x131f   :  { %v1630_v9 = vmul.f32 %v3926_v56, %v1614_v10 }
0x1320   :  { %v1639_v7 = vmul.f32 %v3140_v53, %v1631_v57 }
0x1321   :  { %v1638_v59 = vmul.f32 %v3140_v53, %v1630_v9 }
0x1322   :  { %v4584_v61 = vadd.f32 %v3141_v58, %v1639_v7 }
0x1323   :  { %v4582_v60 = vadd.f32 %v3141_v58, %v1638_v59 }
0x1325   :  { %3480 = vmatprep.mubr.msk.f32.mxu1 %vm236_vm4, %v4582_v60 }
0x1326   :  { %3481 = vmatmul.mubr.msk.f32.vlgmr.msra.gmra.mrb[14].mxu1 %vm236_vm4, %v4584_v61 }
0x13f9   :  { %v3482_v63 = vpop.f32.mrb[14].mxu1 }
0x13fa   :  { %v4593_v0 = vadd.f32 %v3482_v63, %v3168_v62  ;;  %v1766_v55 = vpop.f32.mrb[15].mxu1 }
0x13fb   :  { %v4595_v1 = vadd.f32 %v3168_v62, %v1766_v55 }
0x13fd   :  { %3487 = vmatprep.mubr.msk.f32.mxu1 %vm440_vm5, %v4595_v1  ;;  %v4601_v3 = vpack.i.bf16 %v4593_v0, %v4595_v1 }
0x13ff   :  { %3845 = vrot.lane.b32.xlu1 %v4601_v3, %s4101_s17  ;;  %3840 = vrot.lane.b32.xlu0 %v4601_v3, %s4099_s20 }
0x1403   :  { %1977 = vrot.lane.b32.xlu1 %v4595_v1, %s4103_s23  ;;  %1979 = vrot.lane.b32.xlu0 %v4593_v0, %s4103_s23 }
0x1471   :  { %v3846_v54 = vpop.permute.xlu1 %3845  ;;  %v3841_v5 = vpop.permute.xlu0 %3840 }
0x1472   :  { %v3848_v6 = vunpack.i.h.bf16 %v3846_v54  ;;  %v3847_v8 = vunpack.i.l.bf16 %v3846_v54  ;;  %v3843_v11 = vunpack.i.h.bf16 %v3841_v5  ;;  %v3842_v12 = vunpack.i.l.bf16 %v3841_v5 }
0x1474   :  { %v3695_v14 = vpack.c.bf16 %v3843_v11, %v3842_v12  ;;  %v3705_v16 = vpack.c.bf16 %v3848_v6, %v3847_v8 }
0x1475   :  { %v1978_v17 = vpop.permute.xlu1 %1977  ;;  %v1980_v19 = vpop.permute.xlu0 %1979 }
0x1476   :  { %3697 = vmatprep.subr.msk.bf16.mxu1 %vm4373_vm6, %v3695_v14 }
0x1477   :  { %3700 = vmatpush3.bf16.xpose.msk.msra.mxu1 %vm4373_vm6, %v3695_v14 }
0x1478   :  { %3707 = vmatprep.subr.msk.bf16.mxu1 %vm4373_vm6, %v3705_v16 }
0x147e   :  { %3488 = vmatmul.mubr.msk.f32.vlgmr.msra.gmra.mrb[16].mxu1 %vm440_vm5, %v4593_v0 }
0x147f   :  { %3710 = vmatpush3.bf16.xpose.msk.msra.mxu1 %vm4373_vm6, %v3705_v16  ;;  %3501 = vmatprep.mubr.msk.f32.mxu1 %vm440_vm5, %v1978_v17 }
0x1486   :  { %3502 = vmatmul.mubr.msk.f32.vlgmr.msra.gmra.mrb[18].mxu1 %vm440_vm5, %v1980_v19 }
0x1551   :  { %v3489_v22 = vpop.f32.mrb[16].mxu1 }
0x1552   :  { %v1865_v24 = vmul.f32 0.35355338, %v3489_v22  ;;  %v1855_v25 = vpop.f32.mrb[17].mxu1 }
0x1553   :  { %v1864_v26 = vmul.f32 0.35355338, %v1855_v25 }
0x1554   :  { %v1867_v27 = vadd.f32 %v1865_v24, %v4387_v18 }
0x1555   :  { %v1866_v4 = vadd.f32 %v1864_v26, %v4389_v20 }
0x1556   :  { %v1871_v2 = vsel %vm528_vm14, %v1867_v27, -inf }
0x1557   :  { %1872 = vmax.xlane.f32.xlu0 %v1871_v2  ;;  %v1868_v13 = vsel %vm528_vm14, %v1866_v4, -inf }
0x1558   :  { %1869 = vmax.xlane.f32.xlu1 %v1868_v13 }
0x1559   :  { %v3503_v21 = vpop.f32.mrb[18].mxu1 }
0x155a   :  { %v2069_v28 = vmul.f32 0.35355338, %v3503_v21  ;;  %v2059_v29 = vpop.f32.mrb[19].mxu1 }
0x155b   :  { %v2068_v30 = vmul.f32 0.35355338, %v2059_v29 }
0x155c   :  { %v2071_v31 = vadd.f32 %v2069_v28, %v4387_v18 }
0x155d   :  { %v2070_v32 = vadd.f32 %v2068_v30, %v4389_v20 }
0x155e   :  { %v2075_v33 = vsel %vm528_vm14, %v2071_v31, -inf }
0x155f   :  { %2076 = vmax.xlane.f32.xlu1 %v2075_v33  ;;  %v2072_v34 = vsel %vm528_vm14, %v2070_v32, -inf }
0x1560   :  { %2073 = vmax.xlane.f32.xlu0 %v2072_v34 }
0x15e4   :  { %v1873_v37 = vpop.xlane.xlu0 %1872 }
0x15e5   :  { %v1875_v10 = vsub.f32 %v1867_v27, %v1873_v37  ;;  %v1870_v38 = vpop.xlane.xlu1 %1869 }
0x15e6   :  { %v1874_v35 = vsub.f32 %v1866_v4, %v1870_v38 }
0x15e7   :  { %v1878_v39 = vmul.f32 1.442695, %v1875_v10 }
0x15e8   :  { %v1876_v40 = vmul.f32 1.442695, %v1874_v35 }
0x15e9   :  { %3927 = vpow2.f32 %v1878_v39 }
0x15ea   :  { %3929 = vpow2.f32 %v1876_v40 }
0x15ec   :  { %v2077_v41 = vpop.xlane.xlu1 %2076 }
0x15ed   :  { %v2079_v42 = vsub.f32 %v2071_v31, %v2077_v41  ;;  %v2074_v43 = vpop.xlane.xlu0 %2073 }
0x15ee   :  { %v2078_v44 = vsub.f32 %v2070_v32, %v2074_v43 }
0x15ef   :  { %v2082_v45 = vmul.f32 1.442695, %v2079_v42 }
0x15f0   :  { %v2080_v46 = vmul.f32 1.442695, %v2078_v44 }
0x15f1   :  { %3931 = vpow2.f32 %v2082_v45 }
0x15f2   :  { %3933 = vpow2.f32 %v2080_v46 }
0x15f3   :  { %v3928_v36 = vpop.eup %3927 }
0x15f4   :  { %v3930_v47 = vpop.eup %3929  ;;  %v1883_v48 = vsel %vm528_vm14, %v3928_v36, 0.0 }
0x15f5   :  { %1884 = vadd.xlane.f32.xlu1 %v1883_v48  ;;  %v1880_v49 = vsel %vm528_vm14, %v3930_v47, 0.0 }
0x15f6   :  { %1881 = vadd.xlane.f32.xlu0 %v1880_v49 }
0x15fb   :  { %v3932_v50 = vpop.eup %3931 }
0x15fc   :  { %v3934_v51 = vpop.eup %3933  ;;  %v2087_v52 = vsel %vm528_vm14, %v3932_v50, 0.0 }
0x15fd   :  { %2088 = vadd.xlane.f32.xlu1 %v2087_v52  ;;  %v2084_v53 = vsel %vm528_vm14, %v3934_v51, 0.0 }
0x15fe   :  { %2085 = vadd.xlane.f32.xlu0 %v2084_v53 }
0x160e   :  { %3855 = vrot.lane.b32.xlu1 %v4601_v3, %s4104_s1 }
0x1612   :  { %3860 = vrot.lane.b32.xlu1 %v4601_v3, %s4106_s26 }
0x1614   :  { %3850 = vrot.lane.b32.xlu0 %v4601_v3, %s4102_s25 }
0x1616   :  { %2183 = vrot.lane.b32.xlu1 %v4593_v0, %s4105_s24 }
0x1618   :  { %2181 = vrot.lane.b32.xlu0 %v4595_v1, %s4105_s24 }
0x1682   :  { %v1885_v57 = vpop.xlane.xlu1 %1884 }
0x1683   :  { %v1882_v56 = vpop.xlane.xlu0 %1881 }
0x1684   :  { %3935 = vrcp.f32 %v1882_v56 }
0x1685   :  { %3937 = vrcp.f32 %v1885_v57 }
0x168a   :  { %v2089_v9 = vpop.xlane.xlu1 %2088 }
0x168b   :  { %v2086_v58 = vpop.xlane.xlu0 %2085 }
0x168c   :  { %3939 = vrcp.f32 %v2086_v58 }
0x168d   :  { %3941 = vrcp.f32 %v2089_v9 }
0x168e   :  { %v3936_v7 = vpop.eup %3935  ;;  %v3856_v59 = vpop.permute.xlu1 %3855 }
0x168f   :  { %v3851_v62 = vpop.permute.xlu0 %3850  ;;  %v1887_v63 = vmul.f32 %v3936_v7, %v3930_v47  ;;  %v3858_v55 = vunpack.i.h.bf16 %v3856_v59  ;;  %v3857_v54 = vunpack.i.l.bf16 %v3856_v59  ;;  %v3938_v12 = vpop.eup %3937 }
0x1690   :  { %v3853_v5 = vunpack.i.h.bf16 %v3851_v62  ;;  %v3852_v6 = vunpack.i.l.bf16 %v3851_v62  ;;  %v1889_v22 = vmul.f32 %v3938_v12, %v3928_v36 }
0x1691   :  { %3494 = vmatprep.mubr.msk.f32.mxu0 %vm528_vm14, %v1887_v63  ;;  %v3711_v14 = vpack.c.bf16 %v3858_v55, %v3857_v54 }
0x1692   :  { %v3701_v8 = vpack.c.bf16 %v3853_v5, %v3852_v6  ;;  %v3861_v11 = vpop.permute.xlu1 %3860 }
0x1693   :  { %v3863_v16 = vunpack.i.h.bf16 %v3861_v11  ;;  %v3862_v17 = vunpack.i.l.bf16 %v3861_v11  ;;  %v2182_v4 = vpop.permute.xlu0 %2181 }
0x1694   :  { %3702 = vmatprep.subr.bf16.mxu0 %v3701_v8 }
0x1695   :  { %3704 = vmatpush3.bf16.msra.mxu0 %v3701_v8  ;;  %v3715_v26 = vpack.c.bf16 %v3863_v16, %v3862_v17 }
0x1696   :  { %v3940_v19 = vpop.eup %3939  ;;  %3712 = vmatprep.subr.bf16.mxu0 %v3711_v14  ;;  %v2184_v2 = vpop.permute.xlu1 %2183 }
0x1697   :  { %v3942_v24 = vpop.eup %3941  ;;  %v2091_v25 = vmul.f32 %v3940_v19, %v3934_v51 }
0x1698   :  { %3495 = vmatmul.mubr.msk.f32.vlgmr.msra.gmra.mrb[12].mxu0 %vm528_vm14, %v1889_v22  ;;  %v2093_v27 = vmul.f32 %v3942_v24, %v3932_v50 }
0x1699   :  { %3714 = vmatpush3.bf16.msra.mxu0 %v3711_v14  ;;  %3508 = vmatprep.mubr.msk.f32.mxu0 %vm528_vm14, %v2091_v25 }
0x169a   :  { %3717 = vmatprep.subr.msk.bf16.mxu0 %vm4373_vm6, %v3715_v26 }
0x169c   :  { %3509 = vmatmul.mubr.msk.f32.vlgmr.msra.gmra.mrb[14].mxu0 %vm528_vm14, %v2093_v27 }
0x169d   :  { %3515 = vmatprep.mubr.msk.f32.mxu0 %vm440_vm5, %v2182_v4 }
0x16a2   :  { %3720 = vmatpush3.bf16.xpose.msk.msra.mxu0 %vm4373_vm6, %v3715_v26 }
0x16a9   :  { %3516 = vmatmul.mubr.msk.f32.vlgmr.msra.gmra.mrb[16].mxu0 %vm440_vm5, %v2184_v2 }
0x176b   :  { %v4655_v13 = vpop.f32.mrb[12].mxu0 }
0x176c   :  { %v4657_v21 = vpop.f32.mrb[13].mxu0 }
0x176f   :  { %v4659_v28 = vpop.f32.mrb[14].mxu0 }
0x1770   :  { %v4661_v29 = vpop.f32.mrb[15].mxu0 }
0x177c   :  { %v3517_v30 = vpop.f32.mrb[16].mxu0 }
0x177d   :  { %v2273_v31 = vmul.f32 0.35355338, %v3517_v30  ;;  %v2263_v32 = vpop.f32.mrb[17].mxu0 }
0x177e   :  { %v2272_v33 = vmul.f32 0.35355338, %v2263_v32 }
0x177f   :  { %v2275_v34 = vadd.f32 %v2273_v31, %v4387_v18 }
0x1780   :  { %v2274_v37 = vadd.f32 %v2272_v33, %v4389_v20 }
0x1781   :  { %v2279_v10 = vsel %vm528_vm14, %v2275_v34, -inf }
0x1782   :  { %2280 = vmax.xlane.f32.xlu1 %v2279_v10  ;;  %v2276_v38 = vsel %vm528_vm14, %v2274_v37, -inf  ;;  %v3147_v10 = vld [vmem:[%s4825_s9 + $0x20] sm:$0xff] }
0x1783   :  { %2277 = vmax.xlane.f32.xlu0 %v2276_v38  ;;  %v3149_v38 = vld [vmem:[%s4825_s9 + $0x30] sm:$0xff] }
0x1793   :  { %3865 = vrot.lane.b32.xlu1 %v4601_v3, %s4107_s21 }
0x1797   :  { %2385 = vrot.lane.b32.xlu1 %v4595_v1, %s4108_s3 }
0x179b   :  { %2387 = vrot.lane.b32.xlu1 %v4593_v0, %s4108_s3  ;;  %s4861_s3 = smov 24  }
0x180f   :  { %v2281_v35 = vpop.xlane.xlu1 %2280 }
0x1810   :  { %v2283_v39 = vsub.f32 %v2275_v34, %v2281_v35  ;;  %v2278_v40 = vpop.xlane.xlu0 %2277 }
0x1811   :  { %v2282_v41 = vsub.f32 %v2274_v37, %v2278_v40 }
0x1812   :  { %v2286_v42 = vmul.f32 1.442695, %v2283_v39  ;;  %v3150_v39 = vld [vmem:[%s4825_s9 + $0x38] sm:$0xff] }
0x1813   :  { %v2284_v43 = vmul.f32 1.442695, %v2282_v41  ;;  %v3866_v44 = vpop.permute.xlu1 %3865  ;;  %v3739_v40 = vpack.c.bf16 %v3150_v39, %v3149_v38  ;;  %v3162_v38 = vld [vmem:[%s4831_s15 + $0x58] sm:$0xff]  ;;  %v3163_v39 = vld [vmem:[%s4831_s15 + $0x60] sm:$0xff] }
0x1814   :  { %3943 = vpow2.f32 %v2286_v42  ;;  %v3868_v45 = vunpack.i.h.bf16 %v3866_v44  ;;  %v3867_v46 = vunpack.i.l.bf16 %v3866_v44 }
0x1815   :  { %3945 = vpow2.f32 %v2284_v43 }
0x1816   :  { %v3721_v36 = vpack.c.bf16 %v3868_v45, %v3867_v46 }
0x1817   :  { %v2386_v59 = vpop.permute.xlu1 %2385 }
0x1818   :  { %3722 = vmatprep.subr.bf16.mxu1 %v3721_v36 }
0x1819   :  { %3724 = vmatpush3.bf16.msra.mxu1 %v3721_v36 }
0x181b   :  { %v2388_v62 = vpop.permute.xlu1 %2387 }
0x181e   :  { %v3944_v47 = vpop.eup %3943 }
0x181f   :  { %v2291_v1 = vsel %vm528_vm14, %v3944_v47, 0.0  ;;  %v3946_v48 = vpop.eup %3945 }
0x1820   :  { %2292 = vadd.xlane.f32.xlu0 %v2291_v1  ;;  %v2288_v0 = vsel %vm528_vm14, %v3946_v48, 0.0 }
0x1824   :  { %2289 = vadd.xlane.f32.xlu0 %v2288_v0 }
0x183a   :  { %3870 = vrot.lane.b32.xlu0 %v4601_v3, %s4109_s28 }
0x18ad   :  { %v2293_v49 = vpop.xlane.xlu0 %2292 }
0x18ae   :  { %3947 = vrcp.f32 %v2293_v49 }
0x18b1   :  { %v2290_v50 = vpop.xlane.xlu0 %2289 }
0x18b2   :  { %3949 = vrcp.f32 %v2290_v50 }
0x18b5   :  { %v3871_v51 = vpop.permute.xlu0 %3870 }
0x18b6   :  { %v3873_v52 = vunpack.i.h.bf16 %v3871_v51  ;;  %v3872_v53 = vunpack.i.l.bf16 %v3871_v51 }
0x18b8   :  { %v3725_v56 = vpack.c.bf16 %v3873_v52, %v3872_v53  ;;  %v3948_v57 = vpop.eup %3947 }
0x18b9   :  { %v2297_v7 = vmul.f32 %v3948_v57, %v3944_v47 }
0x18ba   :  { %3727 = vmatprep.subr.msk.bf16.mxu1 %vm4373_vm6, %v3725_v56 }
0x18bc   :  { %v3950_v9 = vpop.eup %3949 }
0x18bd   :  { %v2295_v58 = vmul.f32 %v3950_v9, %v3946_v48 }
0x18bf   :  { %3522 = vmatprep.mubr.msk.f32.mxu1 %vm528_vm14, %v2295_v58 }
0x18c0   :  { %3523 = vmatmul.mubr.msk.f32.vlgmr.msra.gmra.mrb[20].mxu1 %vm528_vm14, %v2297_v7 }
0x18c1   :  { %3730 = vmatpush3.bf16.xpose.msk.msra.mxu1 %vm4373_vm6, %v3725_v56  ;;  %3529 = vmatprep.mubr.msk.f32.mxu1 %vm440_vm5, %v2386_v59 }
0x18c8   :  { %3530 = vmatmul.mubr.msk.f32.vlgmr.msra.gmra.mrb[22].mxu1 %vm440_vm5, %v2388_v62 }
0x1993   :  { %v3524_v63 = vpop.f32.mrb[20].mxu1 }
0x1994   :  { %v2376_v55 = vpop.f32.mrb[21].mxu1 }
0x199b   :  { %v3531_v54 = vpop.f32.mrb[22].mxu1 }
0x199c   :  { %v2477_v5 = vmul.f32 0.35355338, %v3531_v54  ;;  %v2467_v6 = vpop.f32.mrb[23].mxu1 }
0x199d   :  { %v2476_v8 = vmul.f32 0.35355338, %v2467_v6 }
0x199e   :  { %v2479_v11 = vadd.f32 %v2477_v5, %v4387_v18 }
0x199f   :  { %v2478_v12 = vadd.f32 %v2476_v8, %v4389_v20 }
0x19a0   :  { %v2483_v14 = vsel %vm528_vm14, %v2479_v11, -inf }
0x19a1   :  { %2484 = vmax.xlane.f32.xlu1 %v2483_v14  ;;  %v2480_v15 = vsel %vm528_vm14, %v2478_v12, -inf }
0x19a2   :  { %2481 = vmax.xlane.f32.xlu0 %v2480_v15  ;;  %v3156_v15 = vld [vmem:[%s4829_s13 + $0x30] sm:$0xff] }
0x19b2   :  { %3875 = vrot.lane.b32.xlu1 %v4601_v3, %s4110_s18 }
0x19b6   :  { %2593 = vrot.lane.b32.xlu1 %v4659_v28, %s4111_s22 }
0x19ba   :  { %2599 = vrot.lane.b32.xlu1 %v2376_v55, %s4860_s8 }
0x1a2e   :  { %v2485_v16 = vpop.xlane.xlu1 %2484 }
0x1a2f   :  { %v2487_v17 = vsub.f32 %v2479_v11, %v2485_v16  ;;  %v2482_v19 = vpop.xlane.xlu0 %2481  ;;  %v3157_v16 = vld [vmem:[%s4829_s13 + $0x38] sm:$0xff] }
0x1a30   :  { %v2486_v18 = vsub.f32 %v2478_v12, %v2482_v19  ;;  %v3155_v12 = vld [vmem:[%s4829_s13 + $0x28] sm:$0xff] }
0x1a31   :  { %v2490_v22 = vmul.f32 1.442695, %v2487_v17  ;;  %v3747_v17 = vpack.c.bf16 %v3157_v16, %v3156_v15 }
0x1a32   :  { %v2488_v20 = vmul.f32 1.442695, %v2486_v18  ;;  %v3876_v24 = vpop.permute.xlu1 %3875 }
0x1a33   :  { %v3878_v25 = vunpack.i.h.bf16 %v3876_v24  ;;  %v3877_v26 = vunpack.i.l.bf16 %v3876_v24 }
0x1a34   :  { %3951 = vpow2.f32 %v2488_v20 }
0x1a35   :  { %v3731_v27 = vpack.c.bf16 %v3878_v25, %v3877_v26  ;;  %3953 = vpow2.f32 %v2490_v22 }
0x1a36   :  { %v2594_v44 = vpop.permute.xlu1 %2593 }
0x1a37   :  { %3732 = vmatprep.subr.bf16.mxu0 %v3731_v27  ;;  %v2614_v1 = vsel %vm440_vm5, %v4655_v13, %v2594_v44 }
0x1a38   :  { %3734 = vmatpush3.bf16.msra.mxu0 %v3731_v27  ;;  %v3198_v27 = vld [vmem:[%s4827_s11 + $0x1] ss:$0 sm:$0xff] }
0x1a3a   :  { %v2600_v46 = vpop.permute.xlu1 %2599 }
0x1a3e   :  { %v3952_v3 = vpop.eup %3951 }
0x1a3f   :  { %v2492_v4 = vsel %vm528_vm14, %v3952_v3, 0.0  ;;  %v3954_v2 = vpop.eup %3953 }
0x1a40   :  { %2493 = vadd.xlane.f32.xlu0 %v2492_v4  ;;  %v2495_v28 = vsel %vm528_vm14, %v3954_v2, 0.0 }
0x1a44   :  { %2496 = vadd.xlane.f32.xlu0 %v2495_v28  ;;  %v3199_v28 = vld [vmem:[%s4828_s12 + $0x1] ss:$0 sm:$0xff] }
0x1a5a   :  { %2591 = vrot.lane.b32.xlu0 %v4661_v29, %s4111_s22  ;;  %v3148_v29 = vld [vmem:[%s4825_s9 + $0x28] sm:$0xff] }
0x1a5b   :  { %v3735_v35 = vpack.c.bf16 %v3148_v29, %v3147_v10  ;;  %v3161_v29 = vld [vmem:[%s4831_s15 + $0x50] sm:$0xff] }
0x1a5d   :  { %3736 = vmatprep.subr.bf16.mxu0 %v3735_v35 }
0x1a5e   :  { %2601 = vrot.lane.b32.xlu0 %v3524_v63, %s4860_s8 }
0x1acd   :  { %v2494_v30 = vpop.xlane.xlu0 %2493 }
0x1ace   :  { %3955 = vrcp.f32 %v2494_v30 }
0x1ad1   :  { %v2497_v31 = vpop.xlane.xlu0 %2496 }
0x1ad2   :  { %3957 = vrcp.f32 %v2497_v31 }
0x1ad5   :  { %v2592_v43 = vpop.permute.xlu0 %2591 }
0x1ad6   :  { %v2613_v36 = vsel %vm440_vm5, %v4657_v21, %v2592_v43  ;;  %v3195_v21 = vld [vmem:[%s4826_s10 + $0x1] ss:$0 sm:$0xff]  ;;  %v3166_v43 = vld [vmem:[%s4831_s15 + $0x78] sm:$0xff] }
0x1ad7   :  { %v2615_v0 = vsel %vm528_vm14, %v2613_v36, %v2600_v46 }
0x1ad8   :  { %v3956_v32 = vpop.eup %3955 }
0x1ad9   :  { %v2499_v33 = vmul.f32 %v3956_v32, %v3952_v3  ;;  %v2602_v45 = vpop.permute.xlu0 %2601 }
0x1ada   :  { %v2616_v49 = vsel %vm528_vm14, %v2614_v1, %v2602_v45  ;;  %v3200_v45 = vld [vmem:[%s4830_s14 + $0x1] ss:$0 sm:$0xff] }
0x1adb   :  { %3536 = vmatprep.mubr.msk.f32.mxu0 %vm528_vm14, %v2499_v33 }
0x1adc   :  { %v3958_v34 = vpop.eup %3957 }
0x1add   :  { %v2501_v37 = vmul.f32 %v3958_v34, %v3954_v2  ;;  %v3159_v34 = vld [vmem:[%s4831_s15 + $0x40] sm:$0xff] }
0x1adf   :  { %3537 = vmatmul.mubr.msk.f32.vlgmr.msra.gmra.mrb[18].mxu0 %vm528_vm14, %v2501_v37  ;;  %v3160_v37 = vld [vmem:[%s4831_s15 + $0x48] sm:$0xff] }
0x1ae0   :  { %3738 = vmatpush3.bf16.msra.mxu0 %v3735_v35  ;;  %v3751_v10 = vpack.c.bf16 %v3160_v37, %v3159_v34  ;;  %v3755_v35 = vpack.c.bf16 %v3162_v38, %v3161_v29 }
0x1ae1   :  { %3740 = vmatprep.subr.bf16.mxu0 %v3739_v40 }
0x1ae4   :  { %3742 = vmatpush3.bf16.msra.mxu0 %v3739_v40  ;;  %v3164_v40 = vld [vmem:[%s4831_s15 + $0x68] sm:$0xff] }
0x1ae5   :  { %3752 = vmatprep.subr.bf16.mxu0 %v3751_v10 }
0x1bb2   :  { %v3538_v41 = vpop.f32.mrb[18].mxu0 }
0x1bb3   :  { %2609 = vrot.lane.b32.xlu0 %v3538_v41, %s4861_s3  ;;  %v2580_v42 = vpop.f32.mrb[19].mxu0  ;;  %v3759_v41 = vpack.c.bf16 %v3164_v40, %v3163_v39 }
0x1bb4   :  { %2607 = vrot.lane.b32.xlu1 %v2580_v42, %s4861_s3  ;;  %v3165_v42 = vld [vmem:[%s4831_s15 + $0x70] sm:$0xff] }
0x1bb5   :  { %v3763_v44 = vpack.c.bf16 %v3166_v43, %v3165_v42  ;;  %v3207_v42 = vld [vmem:[#allocation7 + $0x1] ss:$0 sm:$0xff] }
0x1c25   :  { %v2610_v47 = vpop.permute.xlu0 %2609 }
0x1c26   :  { %v2608_v48 = vpop.permute.xlu1 %2607  ;;  %v2618_v51 = vsel %vm1278_vm15, %v2616_v49, %v2610_v47 }
0x1c27   :  { %v2617_v50 = vsel %vm1278_vm15, %v2615_v0, %v2608_v48 }
0x1c28   :  { %3547 = vmatprep.mubr.msk.f32.mxu0 %vm236_vm4, %v2617_v50 }
0x1c29   :  { %3548 = vmatmul.mubr.msk.f32.vlgmr.msra.gmra.mrb[20].mxu0 %vm236_vm4, %v2618_v51 }
0x1c2a   :  { %3754 = vmatpush3.bf16.msra.mxu0 %v3751_v10 }
0x1c2b   :  { %3756 = vmatprep.subr.bf16.mxu0 %v3755_v35 }
0x1c2e   :  { %3758 = vmatpush3.bf16.msra.mxu0 %v3755_v35  ;;  %v3206_v35 = vld [vmem:[#allocation5 + $0x1] ss:$0 sm:$0xff] }
0x1c2f   :  { %3760 = vmatprep.subr.bf16.mxu0 %v3759_v41 }
0x1c32   :  { %3762 = vmatpush3.bf16.msra.mxu0 %v3759_v41 }
0x1c33   :  { %3764 = vmatprep.subr.bf16.mxu0 %v3763_v44 }
0x1c36   :  { %3766 = vmatpush3.bf16.msra.mxu0 %v3763_v44 }
0x1cfc   :  { %v3549_v52 = vpop.f32.mrb[20].mxu0 }
0x1cfd   :  { %v2703_v53 = vadd.f32 %v3549_v52, %v3195_v21  ;;  %v2697_v13 = vpop.f32.mrb[21].mxu0 }
0x1cfe   :  { %v2698_v56 = vadd.f32 %v3195_v21, %v2697_v13 }
0x1cff   :  { %v2707_v57 = vadd.f32 %v2703_v53, %v4584_v61 }
0x1d00   :  { %v2706_v9 = vadd.f32 %v2698_v56, %v4582_v60  ;;  %v3154_v60 = vld [vmem:[%s4829_s13 + $0x20] sm:$0xff] }
0x1d01   :  { %v2711_v58 = vsel %vm236_vm4, %v2707_v57, 0.0  ;;  %v3743_v14 = vpack.c.bf16 %v3155_v12, %v3154_v60 }
0x1d02   :  { %2712 = vadd.xlane.f32.xlu0 %v2711_v58  ;;  %v2708_v7 = vsel %vm236_vm4, %v2706_v9, 0.0 }
0x1d03   :  { %2709 = vadd.xlane.f32.xlu1 %v2708_v7  ;;  %3744 = vmatprep.subr.bf16.mxu1 %v3743_v14 }
0x1d04   :  { %3746 = vmatpush3.bf16.msra.mxu1 %v3743_v14 }
0x1d05   :  { %3748 = vmatprep.subr.bf16.mxu1 %v3747_v17 }
0x1d08   :  { %3750 = vmatpush3.bf16.msra.mxu1 %v3747_v17 }
0x1d8f   :  { %v2713_v59 = vpop.xlane.xlu0 %2712 }
0x1d90   :  { %v2715_v62 = vmul.f32 0.03125, %v2713_v59  ;;  %v2710_v63 = vpop.xlane.xlu1 %2709 }
0x1d91   :  { %v2714_v55 = vmul.f32 0.03125, %v2710_v63 }
0x1d92   :  { %v2717_v54 = vsub.f32 %v2707_v57, %v2715_v62 }
0x1d93   :  { %v2716_v5 = vsub.f32 %v2706_v9, %v2714_v55 }
0x1d94   :  { %v2719_v6 = vmul.f32 %v2717_v54, %v2717_v54 }
0x1d95   :  { %v2718_v8 = vmul.f32 %v2716_v5, %v2716_v5 }
0x1d96   :  { %v2723_v11 = vsel %vm236_vm4, %v2719_v6, 0.0 }
0x1d97   :  { %2724 = vadd.xlane.f32.xlu1 %v2723_v11  ;;  %v2720_v61 = vsel %vm236_vm4, %v2718_v8, 0.0 }
0x1d98   :  { %2721 = vadd.xlane.f32.xlu0 %v2720_v61 }
0x1e24   :  { %v2725_v19 = vpop.xlane.xlu1 %2724 }
0x1e25   :  { %v2727_v18 = vmul.f32 0.03125, %v2725_v19  ;;  %v2722_v22 = vpop.xlane.xlu0 %2721 }
0x1e26   :  { %v2726_v20 = vmul.f32 0.03125, %v2722_v22 }
0x1e27   :  { %v2729_v24 = vadd.f32 1e-12, %v2727_v18 }
0x1e28   :  { %v2728_v25 = vadd.f32 1e-12, %v2726_v20 }
0x1e29   :  { %3959 = vrsqrt.f32 %v2729_v24 }
0x1e2a   :  { %3961 = vrsqrt.f32 %v2728_v25 }
0x1e33   :  { %v3960_v26 = vpop.eup %3959 }
0x1e34   :  { %v3962_v3 = vpop.eup %3961  ;;  %v2733_v4 = vmul.f32 %v3960_v26, %v2717_v54  ;;  %v3203_v54 = vld [vmem:[%s4832_s16 + $0x1] ss:$0 sm:$0xff] }
0x1e35   :  { %v2732_v2 = vmul.f32 %v3962_v3, %v2716_v5  ;;  %v2992_v3 = vld [vmem:[%s4835_s19 + $0x8] sm:$0xff] }
0x1e36   :  { %v2741_v30 = vmul.f32 %v3198_v27, %v2733_v4 }
0x1e37   :  { %v2740_v31 = vmul.f32 %v3198_v27, %v2732_v2  ;;  %v2991_v27 = vld [vmem:[%s4835_s19] sm:$0xff]  ;;  %v4113_v2 = vmov 0.0|0.0  }
0x1e38   :  { %v2749_v33 = vadd.f32 %v3199_v28, %v2741_v30  ;;  %v3768_v4 = vpack.c.bf16 %v2992_v3, %v2991_v27  ;;  %3767 = vmatprep.subr.bf16.mxu1 %v4113_v2  ;;  %v2994_v30 = vld [vmem:[%s4835_s19 + $0x18] sm:$0xff] }
0x1e39   :  { %v2748_v32 = vadd.f32 %v3199_v28, %v2740_v31  ;;  %v2993_v28 = vld [vmem:[%s4835_s19 + $0x10] sm:$0xff]  ;;  %s4115_s19 = smov [#allocation10]  }
0x1e3a   :  { %v3771_v31 = vpack.c.bf16 %v2994_v30, %v2993_v28  ;;  %s3084_s13 = sshll.u32 %s4115_s19, 4  ;;  %s3085_s13 = int_to_ptr.vmem [resolvable:$true] %s3084_s13 }
0x1e3b   :  { %3558 = vmatprep.mubr.msk.f32.mxu1 %vm236_vm4, %v2748_v32  ;;  %s4061_s7 = scalar_lea.vmem %s3085_s13, 32  ;;  %p4066_p5 = scmp.lt.s32.totalorder %s3085_s13, %s3085_s13 }
0x1e3c   :  { %3559 = vmatmul.mubr.msk.f32.vlgmr.msra.gmra.mrb[24].mxu1 %vm236_vm4, %v2749_v33  ;;  %p4062_p4 = scmp.ne.s32.totalorder %s3085_s13, %s4061_s7  ;;  %p4067_p6 = scmp.lt.s32.totalorder %s4061_s7, %s4061_s7 }
0x1e3d   :  { %3769 = vmatpush3.bf16.msra.mxu1 %v3768_v4  ;;  %3588 = vmatprep.mubr.msk.f32.mxu1 %vm4114_vm0, %v4098_v23 }
0x1e3e   :  { %3770 = vmatprep.subr.bf16.mxu1 %v4113_v2  ;;  %p4068_p7 = por %p4067_p6, %p4066_p5 }
0x1e40   :  { %p4069_p8 = pnand %p4068_p7, %p4062_p4 }
0x1e41   :  { %3772 = vmatpush3.bf16.msra.mxu1 %v3771_v31 }
0x1f0f   :  { %v3560_v46 = vpop.f32.mrb[24].mxu1 }
0x1f10   :  { %v2834_v36 = vadd.f32 %v3560_v46, %v3200_v45  ;;  %v2828_v47 = vpop.f32.mrb[25].mxu1 }
0x1f11   :  { %v2829_v1 = vadd.f32 %v3200_v45, %v2828_v47  ;;  %v3208_v47 = vld [vmem:[#allocation8] ss:$0 sm:$0xff] }
0x1f12   :  { %v2838_v48 = vmul.f32 %v2834_v36, %v2834_v36 }
0x1f13   :  { %v2837_v0 = vmul.f32 %v2829_v1, %v2829_v1 }
0x1f14   :  { %v2840_v49 = vmul.f32 %v2838_v48, %v2834_v36 }
0x1f15   :  { %v2839_v50 = vmul.f32 %v2837_v0, %v2829_v1 }
0x1f16   :  { %v2842_v51 = vmul.f32 0.044715, %v2840_v49 }
0x1f17   :  { %v2841_v21 = vmul.f32 0.044715, %v2839_v50 }
0x1f18   :  { %v2844_v52 = vadd.f32 %v2842_v51, %v2834_v36 }
0x1f19   :  { %v2843_v53 = vadd.f32 %v2841_v21, %v2829_v1 }
0x1f1a   :  { %v2846_v13 = vmul.f32 0.7978846, %v2844_v52 }
0x1f1b   :  { %v2845_v56 = vmul.f32 0.7978846, %v2843_v53 }
0x1f1c   :  { %3963 = vtanh.f32 %v2846_v13 }
0x1f1d   :  { %3965 = vtanh.f32 %v2845_v56 }
0x1f26   :  { %v3964_v57 = vpop.eup %3963 }
0x1f27   :  { %v3966_v9 = vpop.eup %3965  ;;  %v2850_v58 = vadd.f32 1.0, %v3964_v57 }
0x1f28   :  { %v2849_v7 = vadd.f32 1.0, %v3966_v9 }
0x1f29   :  { %v2852_v59 = vmul.f32 0.5, %v2850_v58 }
0x1f2a   :  { %v2851_v62 = vmul.f32 0.5, %v2849_v7 }
0x1f2b   :  { %v2854_v55 = vmul.f32 %v2852_v59, %v2834_v36 }
0x1f2c   :  { %v2853_v63 = vmul.f32 %v2851_v62, %v2829_v1 }
0x1f2e   :  { %3577 = vmatprep.mubr.msk.f32.mxu0 %vm145_vm1, %v2853_v63 }
0x1f2f   :  { %3578 = vmatmul.mubr.msk.f32.vlgmr.msra.gmra.mrb[22].mxu0 %vm145_vm1, %v2854_v55  ;;  %vm2989_vm1 = vcmask 1040384  }
0x2002   :  { %v3579_v5 = vpop.f32.mrb[22].mxu0 }
0x2003   :  { %v2939_v6 = vadd.f32 %v3579_v5, %v3203_v54  ;;  %v2933_v8 = vpop.f32.mrb[23].mxu0 }
0x2004   :  { %v2934_v11 = vadd.f32 %v3203_v54, %v2933_v8 }
0x2005   :  { %v2943_v61 = vadd.f32 %v2939_v6, %v2749_v33 }
0x2006   :  { %v2942_v60 = vadd.f32 %v2934_v11, %v2748_v32 }
0x2007   :  { %v2947_v12 = vsel %vm236_vm4, %v2943_v61, 0.0 }
0x2008   :  { %2948 = vadd.xlane.f32.xlu0 %v2947_v12  ;;  %v2944_v14 = vsel %vm236_vm4, %v2942_v60, 0.0 }
0x2009   :  { %2945 = vadd.xlane.f32.xlu1 %v2944_v14 }
0x2095   :  { %v2949_v15 = vpop.xlane.xlu0 %2948 }
0x2096   :  { %v2951_v16 = vmul.f32 0.03125, %v2949_v15  ;;  %v2946_v17 = vpop.xlane.xlu1 %2945 }
0x2097   :  { %v2950_v19 = vmul.f32 0.03125, %v2946_v17 }
0x2098   :  { %v2953_v18 = vsub.f32 %v2943_v61, %v2951_v16 }
0x2099   :  { %v2952_v22 = vsub.f32 %v2942_v60, %v2950_v19 }
0x209a   :  { %v2955_v20 = vmul.f32 %v2953_v18, %v2953_v18 }
0x209b   :  { %v2954_v24 = vmul.f32 %v2952_v22, %v2952_v22 }
0x209c   :  { %v2959_v25 = vsel %vm236_vm4, %v2955_v20, 0.0 }
0x209d   :  { %2960 = vadd.xlane.f32.xlu0 %v2959_v25  ;;  %v2956_v26 = vsel %vm236_vm4, %v2954_v24, 0.0 }
0x209e   :  { %2957 = vadd.xlane.f32.xlu1 %v2956_v26 }
0x212a   :  { %v2961_v32 = vpop.xlane.xlu0 %2960 }
0x212b   :  { %v2963_v33 = vmul.f32 0.03125, %v2961_v32  ;;  %v2958_v34 = vpop.xlane.xlu1 %2957 }
0x212c   :  { %v2962_v37 = vmul.f32 0.03125, %v2958_v34 }
0x212d   :  { %v2965_v10 = vadd.f32 1e-12, %v2963_v33 }
0x212e   :  { %v2964_v29 = vadd.f32 1e-12, %v2962_v37 }
0x212f   :  { %3967 = vrsqrt.f32 %v2965_v10 }
0x2130   :  { %3969 = vrsqrt.f32 %v2964_v29 }
0x2139   :  { %v3968_v38 = vpop.eup %3967 }
0x213a   :  { %v3970_v39 = vpop.eup %3969  ;;  %v2969_v40 = vmul.f32 %v3968_v38, %v2953_v18 }
0x213b   :  { %v2968_v41 = vmul.f32 %v3970_v39, %v2952_v22 }
0x213c   :  { %v2977_v43 = vmul.f32 %v3206_v35, %v2969_v40 }
0x213d   :  { %v2976_v44 = vmul.f32 %v3206_v35, %v2968_v41 }
0x213e   :  { %v2985_v45 = vadd.f32 %v3207_v42, %v2977_v43 }
0x213f   :  { %v2984_v23 = vadd.f32 %v3207_v42, %v2976_v44 }
0x2140   :  { %v2987_v46 = vrot.slane %v2985_v45, 7 }
0x2142   :  { %v2990_v36 = vsel %vm2989_vm1, %v2984_v23, %v2987_v46 }
0x2143   :  { %3589 = vmatmul.mubr.msk.f32.vlgmr.msra.gmra.mrb[26].mxu1 %vm236_vm4, %v2990_v36 }
0x2216   :  { %v3071_v1 = vpop.f32.mrb[26].mxu1 }
0x2217   :  { %v3072_v48 = vadd.f32 %v3208_v47, %v3071_v1  ;;  %v3590_v0 = vpop.f32.mrb[27].mxu1 }
0x2219   :  { %3971 = vtanh.f32 %v3072_v48 }
0x2223   :  { %v3972_v49 = vpop.eup %3971 }
0x2224   :  { %3077 = vst.msk [vmem:[#allocation10] sm:$0x3] %vm3076_vm2, %v3972_v49 }
0x2225   :  { %4072 = shalt.err (!%p4069_p8)
}
0x2226   :  { %s4862_s11 = sld [smem:[#allocation21_spill]] }
0x222c   :  { %s4073_s20 = scalar_lea.hbm %s4862_s11, 32 }
0x222d   :  { %p4074_p9 = scmp.ne.s32.totalorder %s4862_s11, %s4073_s20  ;;  %p4077_p10 = scmp.lt.u32.totalorder %s4073_s20, %s4862_s11 }
0x222f   :  { %p4079_p11 = pnand %p4077_p10, %p4074_p9 }
0x2231   :  { %4082 = shalt.err (!%p4079_p11)
}
0x2232   :  { %3087 = dma.vmem_to_hbm [thread:$0]  %s3085_s13, 32, %s4862_s11, [#allocation4]  }
0x2233   :  { %4089 = dma.done.wait [#allocation4], 32  }
0x2234   :  { %4090 = vsyncadd [#allocation4], 4294967264 }
0x2235   :  { %3091 = vsyncpa [#allocation3], 1 }
0x2236   :  { %3092 = vsyncpa [#allocation6], 1 }
0x2237   :  { %3093 = vsyncpa [#allocation9], 1 }
0x2238   :  { %3094 = vsyncpa [#allocation4], 1 }

</bundles_post_ra>
